<compile_context>
chip_gen: v5e
topology: v5e:2x2
jax: 0.10.0
libtpu: 0.0.40
codegen_flags: <defaults>
</compile_context>

<pallas_src>
import functools

import jax
import jax.numpy as jnp
from jax.experimental import pallas as pl
from jax.experimental.pallas import tpu as pltpu

INPUT_SIZE = 4
HIDDEN = 128          # adjusted_hidden_size = 128 // 4 * 4 = 128
HIDDEN2 = 2 * HIDDEN
MEMORY_SIZE = 10
N_LAYERS = 3
N_TASKS = 10
PAD = 128             # lane-dense padding for the narrow (10-wide) dims
EVO_COL = N_TASKS     # padded-output column holding cs . evolution_markers
LN_EPS = 1e-5

TASK_NAMES = (
    'mathematical_logic', 'symbolic_reasoning', 'abstract_reasoning',
    'pattern_recognition', 'reasoning_chain', 'mathematical_proof',
    'logical_chain', 'abstract_concepts', 'creative_reasoning',
    'multi_step_reasoning',
)

_BASE_PARAMS = (
    'enc_w1', 'enc_b1', 'w_ea', 'b_ea',
    'ln1_g', 'ln1_b', 'ln2_g', 'ln2_b',
    'ff_w1', 'ff_b1',
)
_FUSED_FFG = ('ffg_w', 'ffg_b')
_UNFUSED_FFG = ('ff_w2', 'ff_b2', 'gate_w', 'gate_b')
_TAIL_PARAMS = (
    'upd_w', 'upd_b', 'mem_ctl', 'mctl_b',
    'strat_w1', 'strat_b1', 'head_w', 'head_b',
)


def _param_order(fused):
    return _BASE_PARAMS + (_FUSED_FFG if fused else _UNFUSED_FFG) + _TAIL_PARAMS


def _layernorm(z, gamma, beta):
    # One-pass variance (mean(z*z) - mu*mu): saves a full-width subtract+square
    # VPU pass per LayerNorm; eps dominates any tiny cancellation error.
    mu = jnp.mean(z, axis=-1, keepdims=True)
    var = jnp.mean(z * z, axis=-1, keepdims=True) - mu * mu
    return (z - mu) * jax.lax.rsqrt(var + LN_EPS) * gamma + beta


def _make_kernel(names, fused):
    """Build the fused forward kernel for a given parameter ordering."""

    def kernel(x_ref, *refs):
        p = dict(zip(names, refs))
        o_ref = refs[-1]
        f32 = jnp.float32
        bf16 = jnp.bfloat16

        # ---- encoder layer 1: K=4 contraction done as 4 VPU broadcast-FMAs
        # (a matmul pass would be >95% wasted), then ReLU (Dropout: eval no-op).
        x = x_ref[...]                        # (TB, 4) f32
        w1 = p['enc_w1'][...]                 # (4, H)  f32
        h = (p['enc_b1'][...]
             + x[:, 0:1] * w1[0:1, :] + x[:, 1:2] * w1[1:2, :]
             + x[:, 2:3] * w1[2:3, :] + x[:, 3:4] * w1[3:4, :])
        h = jnp.maximum(h, 0.0)

        # ---- encoder Linear2 + length-1 self-attention, prefolded into one
        # matmul (softmax over one key == 1 -> attn == out_proj(value_proj(.))).
        h = (jnp.dot(h.astype(bf16), p['w_ea'][...], preferred_element_type=f32)
             + p['b_ea'][...])

        # ---- stacked reasoning layers (fully unrolled).  Faithful to the
        # PyTorch reference: z = LN1(x) + x; gate applied to the FF output.
        rs = h
        for l in range(N_LAYERS):
            z = _layernorm(rs, p['ln1_g'][l], p['ln1_b'][l]) + rs
            z2 = _layernorm(z, p['ln2_g'][l], p['ln2_b'][l])
            a = (jnp.dot(z2.astype(bf16), p['ff_w1'][l], preferred_element_type=f32)
                 + p['ff_b1'][l])
            a = jnp.maximum(a, 0.0).astype(bf16)
            if fused:
                # One (TB,256)@(256,256) matmul yields [ff | gate_pre]: fully
                # fills the 256x256 MXU (v6e/v7x) and breaks the ff->gate
                # serial dependency.  gate_w was folded into ffg_w host-side.
                y = (jnp.dot(a, p['ffg_w'][l], preferred_element_type=f32)
                     + p['ffg_b'][l])
                ff = y[:, :HIDDEN]
                gate = jax.nn.sigmoid(y[:, HIDDEN:])
            else:
                ff = (jnp.dot(a, p['ff_w2'][l], preferred_element_type=f32)
                      + p['ff_b2'][l])
                gate = jax.nn.sigmoid(
                    jnp.dot(ff.astype(bf16), p['gate_w'][l],
                            preferred_element_type=f32) + p['gate_b'][l])
            # gate*ff + (1-gate)*z rewritten to save one full-width VPU multiply
            rs = z + gate * (ff - z)

        # ---- memory module: mem @ memory_controller.W prefolded host-side.
        # The update gate is zero-padded to 128 lanes; padded gate columns
        # (sigmoid(0)=0.5) hit zero rows of mem_ctl, so the math is exact.
        rs16 = rs.astype(bf16)
        uw = jax.nn.sigmoid(
            jnp.dot(rs16, p['upd_w'][...], preferred_element_type=f32)
            + p['upd_b'][...])
        ms = jnp.tanh(
            jnp.dot(uw.astype(bf16), p['mem_ctl'][...], preferred_element_type=f32)
            + p['mctl_b'][...])

        # ---- reasoning controller: cat([rs, ms], -1) @ [W1a; W1b] as a single
        # K=256 matmul (fills the MXU depth; one fewer MXU op + one fewer add).
        cat = jnp.concatenate([rs16, ms.astype(bf16)], axis=-1)   # (TB, 256) bf16
        s = jnp.maximum(
            jnp.dot(cat, p['strat_w1'][...], preferred_element_type=f32)
            + p['strat_b1'][...], 0.0)
        # TODO(synk): reasoning_classifier softmax only appends a Python-side
        # log string and symbolic_module output is discarded; neither affects
        # the returned dict, so they are not computed.

        # ---- lane-dense head with strat_w2 prefolded in: cols 0..9 = task
        # logits, col EVO_COL = cs . evo, rest 0.  Sigmoids + the batch-global
        # evolution bonus are applied in the wrapper.
        o_ref[...] = (jnp.dot(s.astype(bf16), p['head_w'][...],
                              preferred_element_type=f32)
                      + p['head_b'][...])

    return kernel


def init_params(key):
    """Deterministic synthetic parameters matching the module's shapes (f32)."""
    ks = jax.random.split(key, 32)

    def nrm(k, shape, scale=0.05):
        return (scale * jax.random.normal(k, shape)).astype(jnp.float32)

    H, H2, M, T, L = HIDDEN, HIDDEN2, MEMORY_SIZE, N_TASKS, N_LAYERS
    return dict(
        enc_w1=nrm(ks[0], (INPUT_SIZE, H)), enc_b1=nrm(ks[1], (1, H)),
        enc_w2=nrm(ks[2], (H, H)),          enc_b2=nrm(ks[3], (1, H)),
        attn_wv=nrm(ks[4], (H, H)),         attn_bv=nrm(ks[5], (1, H)),
        attn_wo=nrm(ks[6], (H, H)),         attn_bo=nrm(ks[7], (1, H)),
        ln1_g=jnp.ones((L, 1, H), jnp.float32),
        ln1_b=jnp.zeros((L, 1, H), jnp.float32),
        ln2_g=jnp.ones((L, 1, H), jnp.float32),
        ln2_b=jnp.zeros((L, 1, H), jnp.float32),
        ff_w1=nrm(ks[8], (L, H, H2)),  ff_b1=nrm(ks[9], (L, 1, H2)),
        ff_w2=nrm(ks[10], (L, H2, H)), ff_b2=nrm(ks[11], (L, 1, H)),
        gate_w=nrm(ks[12], (L, H, H)), gate_b=nrm(ks[13], (L, 1, H)),
        mem=nrm(ks[14], (M, H), scale=1.0),
        mctl_w=nrm(ks[15], (H, H)), mctl_b=nrm(ks[16], (1, H)),
        upd_w=nrm(ks[17], (H, M)),  upd_b=nrm(ks[18], (1, M)),
        strat_w1a=nrm(ks[19], (H, H)), strat_w1b=nrm(ks[20], (H, H)),
        strat_b1=nrm(ks[21], (1, H)),
        strat_w2=nrm(ks[22], (H, H)), strat_b2=nrm(ks[23], (1, H)),
        out_w=nrm(ks[24], (H, T)), out_b=nrm(ks[25], (1, T)),
        evo=nrm(ks[26], (1, H), scale=1.0),
    )


def _default_fuse_ff_gate():
    """Enable the FF+gate MXU fusion only on 256x256-MXU chips (v6e / v7x)."""
    try:
        kind = jax.devices()[0].device_kind.lower()
    except Exception:
        return False
    return any(tag in kind for tag in ('v6', 'v7', '7x'))


def prepare_kernel_params(p, fuse_ff_gate=None):
    """Host-side prefolding, lane-padding and bf16 cast of the matmul weights.

    All folds are done in f32; only the final weights are cast to bf16.
    """
    if fuse_ff_gate is None:
        fuse_ff_gate = _default_fuse_ff_gate()
    f32, bf16 = jnp.float32, jnp.bfloat16
    H, M, T = HIDDEN, MEMORY_SIZE, N_TASKS

    # Fold encoder Linear2 -> value_proj -> out_proj (no nonlinearity between).
    w_ea = p['enc_w2'] @ p['attn_wv'] @ p['attn_wo']
    b_ea = (p['enc_b2'] @ p['attn_wv'] + p['attn_bv']) @ p['attn_wo'] + p['attn_bo']

    # Fold memory @ memory_controller.W; pad the M=10 axis to 128 lanes.
    mem_ctl = jnp.zeros((PAD, H), f32).at[:M].set(p['mem'] @ p['mctl_w'])
    upd_w = jnp.zeros((H, PAD), f32).at[:, :M].set(p['upd_w'])
    upd_b = jnp.zeros((1, PAD), f32).at[:, :M].set(p['upd_b'])

    # Stack the strategy-input weights so [rs|ms] needs one K=256 matmul.
    strat_w1 = jnp.concatenate([p['strat_w1a'], p['strat_w1b']], axis=0)

    # Lane-dense output head; column EVO_COL carries the evolution-marker dot.
    # strat_w2 is folded straight into the head (no nonlinearity between).
    out_w = jnp.zeros((H, PAD), f32).at[:, :T].set(p['out_w'])
    out_w = out_w.at[:, EVO_COL].set(p['evo'][0])
    out_b = jnp.zeros((1, PAD), f32).at[:, :T].set(p['out_b'])
    head_w = p['strat_w2'] @ out_w
    head_b = p['strat_b2'] @ out_w + out_b

    kp = dict(
        enc_w1=p['enc_w1'], enc_b1=p['enc_b1'],
        w_ea=w_ea.astype(bf16), b_ea=b_ea,
        ln1_g=p['ln1_g'], ln1_b=p['ln1_b'], ln2_g=p['ln2_g'], ln2_b=p['ln2_b'],
        ff_w1=p['ff_w1'].astype(bf16), ff_b1=p['ff_b1'],
        upd_w=upd_w.astype(bf16), upd_b=upd_b,
        mem_ctl=mem_ctl.astype(bf16), mctl_b=p['mctl_b'],
        strat_w1=strat_w1.astype(bf16), strat_b1=p['strat_b1'],
        head_w=head_w.astype(bf16), head_b=head_b,
    )
    if fuse_ff_gate:
        # [ff_w2 | ff_w2 @ gate_w] -> one (256,256) weight per layer; the gate
        # half's bias is ff_b2 @ gate_w + gate_b.
        ffg_w = jnp.concatenate(
            [p['ff_w2'], jnp.einsum('lij,ljk->lik', p['ff_w2'], p['gate_w'])],
            axis=-1)
        ffg_b = jnp.concatenate(
            [p['ff_b2'],
             jnp.einsum('lij,ljk->lik', p['ff_b2'], p['gate_w']) + p['gate_b']],
            axis=-1)
        kp.update(ffg_w=ffg_w.astype(bf16), ffg_b=ffg_b)
    else:
        kp.update(ff_w2=p['ff_w2'].astype(bf16), ff_b2=p['ff_b2'],
                  gate_w=p['gate_w'].astype(bf16), gate_b=p['gate_b'])
    return kp


def _round_up(x, m):
    return (x + m - 1) // m * m


def _resident_spec(shape):
    """Full-array block whose index never changes -> stays VMEM-resident.

    Note: pipeline_mode=pl.Buffered(1) would halve the (already tiny, <1 MiB)
    weight buffers, but is left off for lowering safety; VMEM is nowhere near
    the limit at the default tile size on any generation.
    """
    nd = len(shape)
    return pl.BlockSpec(shape, lambda i, _nd=nd: (0,) * _nd)


@functools.partial(jax.jit, static_argnames=('block_batch',))
def enhanced_reasoning_forward(x, kparams, *, block_batch=512):
    fused = 'ffg_w' in kparams
    names = _param_order(fused)

    b = x.shape[0]
    # tb is always a multiple of 8 (BlockSpec (8,128) rule) and is capped by
    # block_batch, but sized so the batch grid has >=2 steps whenever the
    # batch allows (keeps both v7x TensorCores busy under 'parallel').
    cap = max(8, (int(block_batch) // 8) * 8)
    half = _round_up((b + 1) // 2, 8)
    tb = min(cap, max(8, half))
    padded = _round_up(b, tb)
    if padded != b:
        x = jnp.pad(x, ((0, padded - b), (0, 0)))

    args = [x] + [kparams[k] for k in names]
    in_specs = [pl.BlockSpec((tb, INPUT_SIZE), lambda i: (i, 0))]
    in_specs += [_resident_spec(kparams[k].shape) for k in names]

    logits = pl.pallas_call(
        _make_kernel(names, fused),
        out_shape=jax.ShapeDtypeStruct((padded, PAD), jnp.float32),
        grid=(padded // tb,),
        in_specs=in_specs,
        out_specs=pl.BlockSpec((tb, PAD), lambda i: (i, 0)),
        compiler_params=pltpu.CompilerParams(
            dimension_semantics=('parallel',)),
    )(*args)

    logits = logits[:b]
    outs = jax.nn.sigmoid(logits[:, :N_TASKS])
    # Batch-global evolution bonus, exact under any batch tiling:
    # sigmoid(mean_b(cs) . evo) == sigmoid(mean_b(cs . evo)).
    bonus = 0.1 * jax.nn.sigmoid(jnp.mean(logits[:, EVO_COL]))
    outs = outs + bonus
    return {name: outs[:, i:i + 1] for i, name in enumerate(TASK_NAMES)}


def reference_forward(x, p):
    """Pure-JAX f32 reference of the original (unfused) eval-mode forward."""
    def ln(z, g, b):
        mu = jnp.mean(z, axis=-1, keepdims=True)
        var = jnp.mean((z - mu) ** 2, axis=-1, keepdims=True)
        return (z - mu) * jax.lax.rsqrt(var + LN_EPS) * g + b

    h = jnp.maximum(x @ p['enc_w1'] + p['enc_b1'], 0.0)
    h = h @ p['enc_w2'] + p['enc_b2']
    v = h @ p['attn_wv'] + p['attn_bv']
    h = v @ p['attn_wo'] + p['attn_bo']
    rs = h
    for l in range(N_LAYERS):
        z = ln(rs, p['ln1_g'][l], p['ln1_b'][l]) + rs
        z2 = ln(z, p['ln2_g'][l], p['ln2_b'][l])
        ff = jnp.maximum(z2 @ p['ff_w1'][l] + p['ff_b1'][l], 0.0)
        ff = ff @ p['ff_w2'][l] + p['ff_b2'][l]
        gate = jax.nn.sigmoid(ff @ p['gate_w'][l] + p['gate_b'][l])
        rs = gate * ff + (1.0 - gate) * z
    uw = jax.nn.sigmoid(rs @ p['upd_w'] + p['upd_b'])
    ms = jnp.tanh((uw @ p['mem']) @ p['mctl_w'] + p['mctl_b'])
    s = jnp.maximum(rs @ p['strat_w1a'] + ms @ p['strat_w1b'] + p['strat_b1'], 0.0)
    cs = s @ p['strat_w2'] + p['strat_b2']
    outs = jax.nn.sigmoid(cs @ p['out_w'] + p['out_b'])
    bonus = 0.1 * jax.nn.sigmoid(jnp.dot(jnp.mean(cs, axis=0), p['evo'][0]))
    outs = outs + bonus
    return {name: outs[:, i:i + 1] for i, name in enumerate(TASK_NAMES)}


if __name__ == "__main__":
    key = jax.random.PRNGKey(0)
    pkey, xkey1, xkey2 = jax.random.split(key, 3)
    params = init_params(pkey)

    # Exercise BOTH kernel variants (unfused FF/gate path used on v5e's
    # 128x128 MXU; fused (256,256) path used on v6e/v7x), each on a
    # single-block batch and a padded multi-block batch grid.
    for fuse in (False, True):
        kparams = prepare_kernel_params(params, fuse_ff_gate=fuse)
        for batch, xkey in ((8, xkey1), (200, xkey2)):
            x = jax.random.normal(xkey, (batch, INPUT_SIZE), dtype=jnp.float32)
            outputs = enhanced_reasoning_forward(x, kparams)
            jax.block_until_ready(outputs)

            ref = reference_forward(x, params)
            assert set(outputs.keys()) == set(TASK_NAMES)
            for name in TASK_NAMES:
                o, r = outputs[name], ref[name]
                assert o.shape == (batch, 1), (name, o.shape)
                assert bool(jnp.all(jnp.isfinite(o))), name
                err = float(jnp.max(jnp.abs(o - r)))
                assert err < 5e-2, (name, fuse, err)   # bf16-weight tolerance

    print("KERNEL_OK")
</pallas_src>

<mosaic_0001>
module attributes {stable_mosaic.version = 11 : i64} {
  func.func @kernel(%arg0: i32, %arg1: memref<8x4xf32, #tpu.memory_space<vmem>>, %arg2: memref<4x128xf32, #tpu.memory_space<vmem>>, %arg3: memref<1x128xf32, #tpu.memory_space<vmem>>, %arg4: memref<128x128xbf16, #tpu.memory_space<vmem>>, %arg5: memref<1x128xf32, #tpu.memory_space<vmem>>, %arg6: memref<3x1x128xf32, #tpu.memory_space<vmem>>, %arg7: memref<3x1x128xf32, #tpu.memory_space<vmem>>, %arg8: memref<3x1x128xf32, #tpu.memory_space<vmem>>, %arg9: memref<3x1x128xf32, #tpu.memory_space<vmem>>, %arg10: memref<3x128x256xbf16, #tpu.memory_space<vmem>>, %arg11: memref<3x1x256xf32, #tpu.memory_space<vmem>>, %arg12: memref<3x256x128xbf16, #tpu.memory_space<vmem>>, %arg13: memref<3x1x128xf32, #tpu.memory_space<vmem>>, %arg14: memref<3x128x128xbf16, #tpu.memory_space<vmem>>, %arg15: memref<3x1x128xf32, #tpu.memory_space<vmem>>, %arg16: memref<128x128xbf16, #tpu.memory_space<vmem>>, %arg17: memref<1x128xf32, #tpu.memory_space<vmem>>, %arg18: memref<128x128xbf16, #tpu.memory_space<vmem>>, %arg19: memref<1x128xf32, #tpu.memory_space<vmem>>, %arg20: memref<256x128xbf16, #tpu.memory_space<vmem>>, %arg21: memref<1x128xf32, #tpu.memory_space<vmem>>, %arg22: memref<128x128xbf16, #tpu.memory_space<vmem>>, %arg23: memref<1x128xf32, #tpu.memory_space<vmem>>, %arg24: memref<8x128xf32, #tpu.memory_space<vmem>>) attributes {dimension_semantics = [#tpu.dimension_semantics<parallel>], iteration_bounds = array<i64: 1>, scalar_prefetch = 0 : i64, scratch_operands = 0 : i64, tpu.core_type = #tpu.core_type<tc>, window_params = [{transform_indices = @transform_0, window_bounds = array<i64: 8, 4>}, {pipeline_mode = #tpu.pipeline_mode<synchronous>, transform_indices = @transform_1, window_bounds = array<i64: 4, 128>}, {pipeline_mode = #tpu.pipeline_mode<synchronous>, transform_indices = @transform_2, window_bounds = array<i64: 1, 128>}, {pipeline_mode = #tpu.pipeline_mode<synchronous>, transform_indices = @transform_3, window_bounds = array<i64: 128, 128>}, {pipeline_mode = #tpu.pipeline_mode<synchronous>, transform_indices = @transform_4, window_bounds = array<i64: 1, 128>}, {pipeline_mode = #tpu.pipeline_mode<synchronous>, transform_indices = @transform_5, window_bounds = array<i64: 3, 1, 128>}, {pipeline_mode = #tpu.pipeline_mode<synchronous>, transform_indices = @transform_6, window_bounds = array<i64: 3, 1, 128>}, {pipeline_mode = #tpu.pipeline_mode<synchronous>, transform_indices = @transform_7, window_bounds = array<i64: 3, 1, 128>}, {pipeline_mode = #tpu.pipeline_mode<synchronous>, transform_indices = @transform_8, window_bounds = array<i64: 3, 1, 128>}, {pipeline_mode = #tpu.pipeline_mode<synchronous>, transform_indices = @transform_9, window_bounds = array<i64: 3, 128, 256>}, {pipeline_mode = #tpu.pipeline_mode<synchronous>, transform_indices = @transform_10, window_bounds = array<i64: 3, 1, 256>}, {pipeline_mode = #tpu.pipeline_mode<synchronous>, transform_indices = @transform_11, window_bounds = array<i64: 3, 256, 128>}, {pipeline_mode = #tpu.pipeline_mode<synchronous>, transform_indices = @transform_12, window_bounds = array<i64: 3, 1, 128>}, {pipeline_mode = #tpu.pipeline_mode<synchronous>, transform_indices = @transform_13, window_bounds = array<i64: 3, 128, 128>}, {pipeline_mode = #tpu.pipeline_mode<synchronous>, transform_indices = @transform_14, window_bounds = array<i64: 3, 1, 128>}, {pipeline_mode = #tpu.pipeline_mode<synchronous>, transform_indices = @transform_15, window_bounds = array<i64: 128, 128>}, {pipeline_mode = #tpu.pipeline_mode<synchronous>, transform_indices = @transform_16, window_bounds = array<i64: 1, 128>}, {pipeline_mode = #tpu.pipeline_mode<synchronous>, transform_indices = @transform_17, window_bounds = array<i64: 128, 128>}, {pipeline_mode = #tpu.pipeline_mode<synchronous>, transform_indices = @transform_18, window_bounds = array<i64: 1, 128>}, {pipeline_mode = #tpu.pipeline_mode<synchronous>, transform_indices = @transform_19, window_bounds = array<i64: 256, 128>}, {pipeline_mode = #tpu.pipeline_mode<synchronous>, transform_indices = @transform_20, window_bounds = array<i64: 1, 128>}, {pipeline_mode = #tpu.pipeline_mode<synchronous>, transform_indices = @transform_21, window_bounds = array<i64: 128, 128>}, {pipeline_mode = #tpu.pipeline_mode<synchronous>, transform_indices = @transform_22, window_bounds = array<i64: 1, 128>}, {transform_indices = @transform_23, window_bounds = array<i64: 8, 128>}]} {
    %c0 = arith.constant 0 : index
    %c0_0 = arith.constant 0 : index
    %0 = vector.load %arg1[%c0, %c0_0] : memref<8x4xf32, #tpu.memory_space<vmem>>, vector<8x4xf32>
    %c0_1 = arith.constant 0 : index
    %c0_2 = arith.constant 0 : index
    %1 = vector.load %arg2[%c0_1, %c0_2] : memref<4x128xf32, #tpu.memory_space<vmem>>, vector<4x128xf32>
    %c0_3 = arith.constant 0 : index
    %c0_4 = arith.constant 0 : index
    %2 = vector.load %arg3[%c0_3, %c0_4] : memref<1x128xf32, #tpu.memory_space<vmem>>, vector<1x128xf32>
    %3 = vector.extract_strided_slice %0 {offsets = [0, 0], sizes = [8, 1], strides = [1, 1]} : vector<8x4xf32> to vector<8x1xf32>
    %4 = vector.extract_strided_slice %1 {offsets = [0, 0], sizes = [1, 128], strides = [1, 1]} : vector<4x128xf32> to vector<1x128xf32>
    %5 = vector.broadcast %3 : vector<8x1xf32> to vector<8x128xf32>
    %6 = vector.broadcast %4 : vector<1x128xf32> to vector<8x128xf32>
    %7 = arith.mulf %5, %6 : vector<8x128xf32>
    %8 = vector.broadcast %2 : vector<1x128xf32> to vector<8x128xf32>
    %9 = arith.addf %8, %7 : vector<8x128xf32>
    %10 = vector.extract_strided_slice %0 {offsets = [0, 1], sizes = [8, 1], strides = [1, 1]} : vector<8x4xf32> to vector<8x1xf32>
    %11 = vector.extract_strided_slice %1 {offsets = [1, 0], sizes = [1, 128], strides = [1, 1]} : vector<4x128xf32> to vector<1x128xf32>
    %12 = vector.broadcast %10 : vector<8x1xf32> to vector<8x128xf32>
    %13 = vector.broadcast %11 : vector<1x128xf32> to vector<8x128xf32>
    %14 = arith.mulf %12, %13 : vector<8x128xf32>
    %15 = arith.addf %9, %14 : vector<8x128xf32>
    %16 = vector.extract_strided_slice %0 {offsets = [0, 2], sizes = [8, 1], strides = [1, 1]} : vector<8x4xf32> to vector<8x1xf32>
    %17 = vector.extract_strided_slice %1 {offsets = [2, 0], sizes = [1, 128], strides = [1, 1]} : vector<4x128xf32> to vector<1x128xf32>
    %18 = vector.broadcast %16 : vector<8x1xf32> to vector<8x128xf32>
    %19 = vector.broadcast %17 : vector<1x128xf32> to vector<8x128xf32>
    %20 = arith.mulf %18, %19 : vector<8x128xf32>
    %21 = arith.addf %15, %20 : vector<8x128xf32>
    %22 = vector.extract_strided_slice %0 {offsets = [0, 3], sizes = [8, 1], strides = [1, 1]} : vector<8x4xf32> to vector<8x1xf32>
    %23 = vector.extract_strided_slice %1 {offsets = [3, 0], sizes = [1, 128], strides = [1, 1]} : vector<4x128xf32> to vector<1x128xf32>
    %24 = vector.broadcast %22 : vector<8x1xf32> to vector<8x128xf32>
    %25 = vector.broadcast %23 : vector<1x128xf32> to vector<8x128xf32>
    %26 = arith.mulf %24, %25 : vector<8x128xf32>
    %27 = arith.addf %21, %26 : vector<8x128xf32>
    %cst = arith.constant 0.000000e+00 : f32
    %28 = vector.broadcast %cst : f32 to vector<8x128xf32>
    %29 = arith.maximumf %27, %28 : vector<8x128xf32>
    %30 = arith.truncf %29 : vector<8x128xf32> to vector<8x128xbf16>
    %c0_5 = arith.constant 0 : index
    %c0_6 = arith.constant 0 : index
    %31 = vector.load %arg4[%c0_5, %c0_6] : memref<128x128xbf16, #tpu.memory_space<vmem>>, vector<128x128xbf16>
    %cst_7 = arith.constant dense<0.000000e+00> : vector<8x128xf32>
    %32 = tpu.matmul %30, %31, %cst_7 {dimension_numbers = #tpu.dot_dimension_numbers<[1], [0], [0], [1], [0, 0, 1, 1], [], []>} : vector<8x128xbf16>, vector<128x128xbf16>, vector<8x128xf32> -> vector<8x128xf32>
    %c0_8 = arith.constant 0 : index
    %c0_9 = arith.constant 0 : index
    %33 = vector.load %arg5[%c0_8, %c0_9] : memref<1x128xf32, #tpu.memory_space<vmem>>, vector<1x128xf32>
    %34 = vector.broadcast %33 : vector<1x128xf32> to vector<8x128xf32>
    %35 = arith.addf %32, %34 : vector<8x128xf32>
    %c0_10 = arith.constant 0 : index
    %c0_11 = arith.constant 0 : index
    %c0_12 = arith.constant 0 : index
    %36 = vector.load %arg6[%c0_10, %c0_11, %c0_12] : memref<3x1x128xf32, #tpu.memory_space<vmem>>, vector<1x1x128xf32>
    %37 = vector.shape_cast %36 : vector<1x1x128xf32> to vector<1x128xf32>
    %c0_13 = arith.constant 0 : index
    %c0_14 = arith.constant 0 : index
    %c0_15 = arith.constant 0 : index
    %38 = vector.load %arg7[%c0_13, %c0_14, %c0_15] : memref<3x1x128xf32, #tpu.memory_space<vmem>>, vector<1x1x128xf32>
    %39 = vector.shape_cast %38 : vector<1x1x128xf32> to vector<1x128xf32>
    %cst_16 = arith.constant dense<0.000000e+00> : vector<8xf32>
    %40 = vector.multi_reduction <add>, %35, %cst_16 [1] : vector<8x128xf32> to vector<8xf32>
    %41 = vector.shape_cast %40 : vector<8xf32> to vector<8x1xf32>
    %cst_17 = arith.constant 1.280000e+02 : f32
    %42 = vector.broadcast %cst_17 : f32 to vector<8x1xf32>
    %43 = arith.divf %41, %42 : vector<8x1xf32>
    %44 = arith.mulf %35, %35 : vector<8x128xf32>
    %cst_18 = arith.constant dense<0.000000e+00> : vector<8xf32>
    %45 = vector.multi_reduction <add>, %44, %cst_18 [1] : vector<8x128xf32> to vector<8xf32>
    %46 = vector.shape_cast %45 : vector<8xf32> to vector<8x1xf32>
    %cst_19 = arith.constant 1.280000e+02 : f32
    %47 = vector.broadcast %cst_19 : f32 to vector<8x1xf32>
    %48 = arith.divf %46, %47 : vector<8x1xf32>
    %49 = arith.mulf %43, %43 : vector<8x1xf32>
    %50 = arith.subf %48, %49 : vector<8x1xf32>
    %51 = vector.broadcast %43 : vector<8x1xf32> to vector<8x128xf32>
    %52 = arith.subf %35, %51 : vector<8x128xf32>
    %cst_20 = arith.constant 9.99999974E-6 : f32
    %53 = vector.broadcast %cst_20 : f32 to vector<8x1xf32>
    %54 = arith.addf %50, %53 : vector<8x1xf32>
    %55 = math.rsqrt %54 : vector<8x1xf32>
    %56 = vector.broadcast %55 : vector<8x1xf32> to vector<8x128xf32>
    %57 = arith.mulf %52, %56 : vector<8x128xf32>
    %58 = vector.broadcast %37 : vector<1x128xf32> to vector<8x128xf32>
    %59 = arith.mulf %57, %58 : vector<8x128xf32>
    %60 = vector.broadcast %39 : vector<1x128xf32> to vector<8x128xf32>
    %61 = arith.addf %59, %60 : vector<8x128xf32>
    %62 = arith.addf %61, %35 : vector<8x128xf32>
    %c0_21 = arith.constant 0 : index
    %c0_22 = arith.constant 0 : index
    %c0_23 = arith.constant 0 : index
    %63 = vector.load %arg8[%c0_21, %c0_22, %c0_23] : memref<3x1x128xf32, #tpu.memory_space<vmem>>, vector<1x1x128xf32>
    %64 = vector.shape_cast %63 : vector<1x1x128xf32> to vector<1x128xf32>
    %c0_24 = arith.constant 0 : index
    %c0_25 = arith.constant 0 : index
    %c0_26 = arith.constant 0 : index
    %65 = vector.load %arg9[%c0_24, %c0_25, %c0_26] : memref<3x1x128xf32, #tpu.memory_space<vmem>>, vector<1x1x128xf32>
    %66 = vector.shape_cast %65 : vector<1x1x128xf32> to vector<1x128xf32>
    %cst_27 = arith.constant dense<0.000000e+00> : vector<8xf32>
    %67 = vector.multi_reduction <add>, %62, %cst_27 [1] : vector<8x128xf32> to vector<8xf32>
    %68 = vector.shape_cast %67 : vector<8xf32> to vector<8x1xf32>
    %cst_28 = arith.constant 1.280000e+02 : f32
    %69 = vector.broadcast %cst_28 : f32 to vector<8x1xf32>
    %70 = arith.divf %68, %69 : vector<8x1xf32>
    %71 = arith.mulf %62, %62 : vector<8x128xf32>
    %cst_29 = arith.constant dense<0.000000e+00> : vector<8xf32>
    %72 = vector.multi_reduction <add>, %71, %cst_29 [1] : vector<8x128xf32> to vector<8xf32>
    %73 = vector.shape_cast %72 : vector<8xf32> to vector<8x1xf32>
    %cst_30 = arith.constant 1.280000e+02 : f32
    %74 = vector.broadcast %cst_30 : f32 to vector<8x1xf32>
    %75 = arith.divf %73, %74 : vector<8x1xf32>
    %76 = arith.mulf %70, %70 : vector<8x1xf32>
    %77 = arith.subf %75, %76 : vector<8x1xf32>
    %78 = vector.broadcast %70 : vector<8x1xf32> to vector<8x128xf32>
    %79 = arith.subf %62, %78 : vector<8x128xf32>
    %cst_31 = arith.constant 9.99999974E-6 : f32
    %80 = vector.broadcast %cst_31 : f32 to vector<8x1xf32>
    %81 = arith.addf %77, %80 : vector<8x1xf32>
    %82 = math.rsqrt %81 : vector<8x1xf32>
    %83 = vector.broadcast %82 : vector<8x1xf32> to vector<8x128xf32>
    %84 = arith.mulf %79, %83 : vector<8x128xf32>
    %85 = vector.broadcast %64 : vector<1x128xf32> to vector<8x128xf32>
    %86 = arith.mulf %84, %85 : vector<8x128xf32>
    %87 = vector.broadcast %66 : vector<1x128xf32> to vector<8x128xf32>
    %88 = arith.addf %86, %87 : vector<8x128xf32>
    %89 = arith.truncf %88 : vector<8x128xf32> to vector<8x128xbf16>
    %c0_32 = arith.constant 0 : index
    %c0_33 = arith.constant 0 : index
    %c0_34 = arith.constant 0 : index
    %90 = vector.load %arg10[%c0_32, %c0_33, %c0_34] : memref<3x128x256xbf16, #tpu.memory_space<vmem>>, vector<1x128x256xbf16>
    %91 = vector.shape_cast %90 : vector<1x128x256xbf16> to vector<128x256xbf16>
    %cst_35 = arith.constant dense<0.000000e+00> : vector<8x256xf32>
    %92 = tpu.matmul %89, %91, %cst_35 {dimension_numbers = #tpu.dot_dimension_numbers<[1], [0], [0], [1], [0, 0, 1, 1], [], []>} : vector<8x128xbf16>, vector<128x256xbf16>, vector<8x256xf32> -> vector<8x256xf32>
    %c0_36 = arith.constant 0 : index
    %c0_37 = arith.constant 0 : index
    %c0_38 = arith.constant 0 : index
    %93 = vector.load %arg11[%c0_36, %c0_37, %c0_38] : memref<3x1x256xf32, #tpu.memory_space<vmem>>, vector<1x1x256xf32>
    %94 = vector.shape_cast %93 : vector<1x1x256xf32> to vector<1x256xf32>
    %95 = vector.broadcast %94 : vector<1x256xf32> to vector<8x256xf32>
    %96 = arith.addf %92, %95 : vector<8x256xf32>
    %cst_39 = arith.constant 0.000000e+00 : f32
    %97 = vector.broadcast %cst_39 : f32 to vector<8x256xf32>
    %98 = arith.maximumf %96, %97 : vector<8x256xf32>
    %99 = arith.truncf %98 : vector<8x256xf32> to vector<8x256xbf16>
    %c0_40 = arith.constant 0 : index
    %c0_41 = arith.constant 0 : index
    %c0_42 = arith.constant 0 : index
    %100 = vector.load %arg12[%c0_40, %c0_41, %c0_42] : memref<3x256x128xbf16, #tpu.memory_space<vmem>>, vector<1x256x128xbf16>
    %101 = vector.shape_cast %100 : vector<1x256x128xbf16> to vector<256x128xbf16>
    %cst_43 = arith.constant dense<0.000000e+00> : vector<8x128xf32>
    %102 = tpu.matmul %99, %101, %cst_43 {dimension_numbers = #tpu.dot_dimension_numbers<[1], [0], [0], [1], [0, 0, 1, 1], [], []>} : vector<8x256xbf16>, vector<256x128xbf16>, vector<8x128xf32> -> vector<8x128xf32>
    %c0_44 = arith.constant 0 : index
    %c0_45 = arith.constant 0 : index
    %c0_46 = arith.constant 0 : index
    %103 = vector.load %arg13[%c0_44, %c0_45, %c0_46] : memref<3x1x128xf32, #tpu.memory_space<vmem>>, vector<1x1x128xf32>
    %104 = vector.shape_cast %103 : vector<1x1x128xf32> to vector<1x128xf32>
    %105 = vector.broadcast %104 : vector<1x128xf32> to vector<8x128xf32>
    %106 = arith.addf %102, %105 : vector<8x128xf32>
    %107 = arith.truncf %106 : vector<8x128xf32> to vector<8x128xbf16>
    %c0_47 = arith.constant 0 : index
    %c0_48 = arith.constant 0 : index
    %c0_49 = arith.constant 0 : index
    %108 = vector.load %arg14[%c0_47, %c0_48, %c0_49] : memref<3x128x128xbf16, #tpu.memory_space<vmem>>, vector<1x128x128xbf16>
    %109 = vector.shape_cast %108 : vector<1x128x128xbf16> to vector<128x128xbf16>
    %cst_50 = arith.constant dense<0.000000e+00> : vector<8x128xf32>
    %110 = tpu.matmul %107, %109, %cst_50 {dimension_numbers = #tpu.dot_dimension_numbers<[1], [0], [0], [1], [0, 0, 1, 1], [], []>} : vector<8x128xbf16>, vector<128x128xbf16>, vector<8x128xf32> -> vector<8x128xf32>
    %c0_51 = arith.constant 0 : index
    %c0_52 = arith.constant 0 : index
    %c0_53 = arith.constant 0 : index
    %111 = vector.load %arg15[%c0_51, %c0_52, %c0_53] : memref<3x1x128xf32, #tpu.memory_space<vmem>>, vector<1x1x128xf32>
    %112 = vector.shape_cast %111 : vector<1x1x128xf32> to vector<1x128xf32>
    %113 = vector.broadcast %112 : vector<1x128xf32> to vector<8x128xf32>
    %114 = arith.addf %110, %113 : vector<8x128xf32>
    %115 = arith.negf %114 : vector<8x128xf32>
    %116 = math.exp %115 : vector<8x128xf32>
    %cst_54 = arith.constant 1.000000e+00 : f32
    %117 = vector.broadcast %cst_54 : f32 to vector<8x128xf32>
    %118 = arith.addf %117, %116 : vector<8x128xf32>
    %119 = arith.divf %117, %118 : vector<8x128xf32>
    %120 = arith.subf %106, %62 : vector<8x128xf32>
    %121 = arith.mulf %119, %120 : vector<8x128xf32>
    %122 = arith.addf %62, %121 : vector<8x128xf32>
    %c1 = arith.constant 1 : index
    %c0_55 = arith.constant 0 : index
    %c0_56 = arith.constant 0 : index
    %123 = vector.load %arg6[%c1, %c0_55, %c0_56] : memref<3x1x128xf32, #tpu.memory_space<vmem>>, vector<1x1x128xf32>
    %124 = vector.shape_cast %123 : vector<1x1x128xf32> to vector<1x128xf32>
    %c1_57 = arith.constant 1 : index
    %c0_58 = arith.constant 0 : index
    %c0_59 = arith.constant 0 : index
    %125 = vector.load %arg7[%c1_57, %c0_58, %c0_59] : memref<3x1x128xf32, #tpu.memory_space<vmem>>, vector<1x1x128xf32>
    %126 = vector.shape_cast %125 : vector<1x1x128xf32> to vector<1x128xf32>
    %cst_60 = arith.constant dense<0.000000e+00> : vector<8xf32>
    %127 = vector.multi_reduction <add>, %122, %cst_60 [1] : vector<8x128xf32> to vector<8xf32>
    %128 = vector.shape_cast %127 : vector<8xf32> to vector<8x1xf32>
    %cst_61 = arith.constant 1.280000e+02 : f32
    %129 = vector.broadcast %cst_61 : f32 to vector<8x1xf32>
    %130 = arith.divf %128, %129 : vector<8x1xf32>
    %131 = arith.mulf %122, %122 : vector<8x128xf32>
    %cst_62 = arith.constant dense<0.000000e+00> : vector<8xf32>
    %132 = vector.multi_reduction <add>, %131, %cst_62 [1] : vector<8x128xf32> to vector<8xf32>
    %133 = vector.shape_cast %132 : vector<8xf32> to vector<8x1xf32>
    %cst_63 = arith.constant 1.280000e+02 : f32
    %134 = vector.broadcast %cst_63 : f32 to vector<8x1xf32>
    %135 = arith.divf %133, %134 : vector<8x1xf32>
    %136 = arith.mulf %130, %130 : vector<8x1xf32>
    %137 = arith.subf %135, %136 : vector<8x1xf32>
    %138 = vector.broadcast %130 : vector<8x1xf32> to vector<8x128xf32>
    %139 = arith.subf %122, %138 : vector<8x128xf32>
    %cst_64 = arith.constant 9.99999974E-6 : f32
    %140 = vector.broadcast %cst_64 : f32 to vector<8x1xf32>
    %141 = arith.addf %137, %140 : vector<8x1xf32>
    %142 = math.rsqrt %141 : vector<8x1xf32>
    %143 = vector.broadcast %142 : vector<8x1xf32> to vector<8x128xf32>
    %144 = arith.mulf %139, %143 : vector<8x128xf32>
    %145 = vector.broadcast %124 : vector<1x128xf32> to vector<8x128xf32>
    %146 = arith.mulf %144, %145 : vector<8x128xf32>
    %147 = vector.broadcast %126 : vector<1x128xf32> to vector<8x128xf32>
    %148 = arith.addf %146, %147 : vector<8x128xf32>
    %149 = arith.addf %148, %122 : vector<8x128xf32>
    %c1_65 = arith.constant 1 : index
    %c0_66 = arith.constant 0 : index
    %c0_67 = arith.constant 0 : index
    %150 = vector.load %arg8[%c1_65, %c0_66, %c0_67] : memref<3x1x128xf32, #tpu.memory_space<vmem>>, vector<1x1x128xf32>
    %151 = vector.shape_cast %150 : vector<1x1x128xf32> to vector<1x128xf32>
    %c1_68 = arith.constant 1 : index
    %c0_69 = arith.constant 0 : index
    %c0_70 = arith.constant 0 : index
    %152 = vector.load %arg9[%c1_68, %c0_69, %c0_70] : memref<3x1x128xf32, #tpu.memory_space<vmem>>, vector<1x1x128xf32>
    %153 = vector.shape_cast %152 : vector<1x1x128xf32> to vector<1x128xf32>
    %cst_71 = arith.constant dense<0.000000e+00> : vector<8xf32>
    %154 = vector.multi_reduction <add>, %149, %cst_71 [1] : vector<8x128xf32> to vector<8xf32>
    %155 = vector.shape_cast %154 : vector<8xf32> to vector<8x1xf32>
    %cst_72 = arith.constant 1.280000e+02 : f32
    %156 = vector.broadcast %cst_72 : f32 to vector<8x1xf32>
    %157 = arith.divf %155, %156 : vector<8x1xf32>
    %158 = arith.mulf %149, %149 : vector<8x128xf32>
    %cst_73 = arith.constant dense<0.000000e+00> : vector<8xf32>
    %159 = vector.multi_reduction <add>, %158, %cst_73 [1] : vector<8x128xf32> to vector<8xf32>
    %160 = vector.shape_cast %159 : vector<8xf32> to vector<8x1xf32>
    %cst_74 = arith.constant 1.280000e+02 : f32
    %161 = vector.broadcast %cst_74 : f32 to vector<8x1xf32>
    %162 = arith.divf %160, %161 : vector<8x1xf32>
    %163 = arith.mulf %157, %157 : vector<8x1xf32>
    %164 = arith.subf %162, %163 : vector<8x1xf32>
    %165 = vector.broadcast %157 : vector<8x1xf32> to vector<8x128xf32>
    %166 = arith.subf %149, %165 : vector<8x128xf32>
    %cst_75 = arith.constant 9.99999974E-6 : f32
    %167 = vector.broadcast %cst_75 : f32 to vector<8x1xf32>
    %168 = arith.addf %164, %167 : vector<8x1xf32>
    %169 = math.rsqrt %168 : vector<8x1xf32>
    %170 = vector.broadcast %169 : vector<8x1xf32> to vector<8x128xf32>
    %171 = arith.mulf %166, %170 : vector<8x128xf32>
    %172 = vector.broadcast %151 : vector<1x128xf32> to vector<8x128xf32>
    %173 = arith.mulf %171, %172 : vector<8x128xf32>
    %174 = vector.broadcast %153 : vector<1x128xf32> to vector<8x128xf32>
    %175 = arith.addf %173, %174 : vector<8x128xf32>
    %176 = arith.truncf %175 : vector<8x128xf32> to vector<8x128xbf16>
    %c1_76 = arith.constant 1 : index
    %c0_77 = arith.constant 0 : index
    %c0_78 = arith.constant 0 : index
    %177 = vector.load %arg10[%c1_76, %c0_77, %c0_78] : memref<3x128x256xbf16, #tpu.memory_space<vmem>>, vector<1x128x256xbf16>
    %178 = vector.shape_cast %177 : vector<1x128x256xbf16> to vector<128x256xbf16>
    %cst_79 = arith.constant dense<0.000000e+00> : vector<8x256xf32>
    %179 = tpu.matmul %176, %178, %cst_79 {dimension_numbers = #tpu.dot_dimension_numbers<[1], [0], [0], [1], [0, 0, 1, 1], [], []>} : vector<8x128xbf16>, vector<128x256xbf16>, vector<8x256xf32> -> vector<8x256xf32>
    %c1_80 = arith.constant 1 : index
    %c0_81 = arith.constant 0 : index
    %c0_82 = arith.constant 0 : index
    %180 = vector.load %arg11[%c1_80, %c0_81, %c0_82] : memref<3x1x256xf32, #tpu.memory_space<vmem>>, vector<1x1x256xf32>
    %181 = vector.shape_cast %180 : vector<1x1x256xf32> to vector<1x256xf32>
    %182 = vector.broadcast %181 : vector<1x256xf32> to vector<8x256xf32>
    %183 = arith.addf %179, %182 : vector<8x256xf32>
    %cst_83 = arith.constant 0.000000e+00 : f32
    %184 = vector.broadcast %cst_83 : f32 to vector<8x256xf32>
    %185 = arith.maximumf %183, %184 : vector<8x256xf32>
    %186 = arith.truncf %185 : vector<8x256xf32> to vector<8x256xbf16>
    %c1_84 = arith.constant 1 : index
    %c0_85 = arith.constant 0 : index
    %c0_86 = arith.constant 0 : index
    %187 = vector.load %arg12[%c1_84, %c0_85, %c0_86] : memref<3x256x128xbf16, #tpu.memory_space<vmem>>, vector<1x256x128xbf16>
    %188 = vector.shape_cast %187 : vector<1x256x128xbf16> to vector<256x128xbf16>
    %cst_87 = arith.constant dense<0.000000e+00> : vector<8x128xf32>
    %189 = tpu.matmul %186, %188, %cst_87 {dimension_numbers = #tpu.dot_dimension_numbers<[1], [0], [0], [1], [0, 0, 1, 1], [], []>} : vector<8x256xbf16>, vector<256x128xbf16>, vector<8x128xf32> -> vector<8x128xf32>
    %c1_88 = arith.constant 1 : index
    %c0_89 = arith.constant 0 : index
    %c0_90 = arith.constant 0 : index
    %190 = vector.load %arg13[%c1_88, %c0_89, %c0_90] : memref<3x1x128xf32, #tpu.memory_space<vmem>>, vector<1x1x128xf32>
    %191 = vector.shape_cast %190 : vector<1x1x128xf32> to vector<1x128xf32>
    %192 = vector.broadcast %191 : vector<1x128xf32> to vector<8x128xf32>
    %193 = arith.addf %189, %192 : vector<8x128xf32>
    %194 = arith.truncf %193 : vector<8x128xf32> to vector<8x128xbf16>
    %c1_91 = arith.constant 1 : index
    %c0_92 = arith.constant 0 : index
    %c0_93 = arith.constant 0 : index
    %195 = vector.load %arg14[%c1_91, %c0_92, %c0_93] : memref<3x128x128xbf16, #tpu.memory_space<vmem>>, vector<1x128x128xbf16>
    %196 = vector.shape_cast %195 : vector<1x128x128xbf16> to vector<128x128xbf16>
    %cst_94 = arith.constant dense<0.000000e+00> : vector<8x128xf32>
    %197 = tpu.matmul %194, %196, %cst_94 {dimension_numbers = #tpu.dot_dimension_numbers<[1], [0], [0], [1], [0, 0, 1, 1], [], []>} : vector<8x128xbf16>, vector<128x128xbf16>, vector<8x128xf32> -> vector<8x128xf32>
    %c1_95 = arith.constant 1 : index
    %c0_96 = arith.constant 0 : index
    %c0_97 = arith.constant 0 : index
    %198 = vector.load %arg15[%c1_95, %c0_96, %c0_97] : memref<3x1x128xf32, #tpu.memory_space<vmem>>, vector<1x1x128xf32>
    %199 = vector.shape_cast %198 : vector<1x1x128xf32> to vector<1x128xf32>
    %200 = vector.broadcast %199 : vector<1x128xf32> to vector<8x128xf32>
    %201 = arith.addf %197, %200 : vector<8x128xf32>
    %202 = arith.negf %201 : vector<8x128xf32>
    %203 = math.exp %202 : vector<8x128xf32>
    %cst_98 = arith.constant 1.000000e+00 : f32
    %204 = vector.broadcast %cst_98 : f32 to vector<8x128xf32>
    %205 = arith.addf %204, %203 : vector<8x128xf32>
    %206 = arith.divf %204, %205 : vector<8x128xf32>
    %207 = arith.subf %193, %149 : vector<8x128xf32>
    %208 = arith.mulf %206, %207 : vector<8x128xf32>
    %209 = arith.addf %149, %208 : vector<8x128xf32>
    %c2 = arith.constant 2 : index
    %c0_99 = arith.constant 0 : index
    %c0_100 = arith.constant 0 : index
    %210 = vector.load %arg6[%c2, %c0_99, %c0_100] : memref<3x1x128xf32, #tpu.memory_space<vmem>>, vector<1x1x128xf32>
    %211 = vector.shape_cast %210 : vector<1x1x128xf32> to vector<1x128xf32>
    %c2_101 = arith.constant 2 : index
    %c0_102 = arith.constant 0 : index
    %c0_103 = arith.constant 0 : index
    %212 = vector.load %arg7[%c2_101, %c0_102, %c0_103] : memref<3x1x128xf32, #tpu.memory_space<vmem>>, vector<1x1x128xf32>
    %213 = vector.shape_cast %212 : vector<1x1x128xf32> to vector<1x128xf32>
    %cst_104 = arith.constant dense<0.000000e+00> : vector<8xf32>
    %214 = vector.multi_reduction <add>, %209, %cst_104 [1] : vector<8x128xf32> to vector<8xf32>
    %215 = vector.shape_cast %214 : vector<8xf32> to vector<8x1xf32>
    %cst_105 = arith.constant 1.280000e+02 : f32
    %216 = vector.broadcast %cst_105 : f32 to vector<8x1xf32>
    %217 = arith.divf %215, %216 : vector<8x1xf32>
    %218 = arith.mulf %209, %209 : vector<8x128xf32>
    %cst_106 = arith.constant dense<0.000000e+00> : vector<8xf32>
    %219 = vector.multi_reduction <add>, %218, %cst_106 [1] : vector<8x128xf32> to vector<8xf32>
    %220 = vector.shape_cast %219 : vector<8xf32> to vector<8x1xf32>
    %cst_107 = arith.constant 1.280000e+02 : f32
    %221 = vector.broadcast %cst_107 : f32 to vector<8x1xf32>
    %222 = arith.divf %220, %221 : vector<8x1xf32>
    %223 = arith.mulf %217, %217 : vector<8x1xf32>
    %224 = arith.subf %222, %223 : vector<8x1xf32>
    %225 = vector.broadcast %217 : vector<8x1xf32> to vector<8x128xf32>
    %226 = arith.subf %209, %225 : vector<8x128xf32>
    %cst_108 = arith.constant 9.99999974E-6 : f32
    %227 = vector.broadcast %cst_108 : f32 to vector<8x1xf32>
    %228 = arith.addf %224, %227 : vector<8x1xf32>
    %229 = math.rsqrt %228 : vector<8x1xf32>
    %230 = vector.broadcast %229 : vector<8x1xf32> to vector<8x128xf32>
    %231 = arith.mulf %226, %230 : vector<8x128xf32>
    %232 = vector.broadcast %211 : vector<1x128xf32> to vector<8x128xf32>
    %233 = arith.mulf %231, %232 : vector<8x128xf32>
    %234 = vector.broadcast %213 : vector<1x128xf32> to vector<8x128xf32>
    %235 = arith.addf %233, %234 : vector<8x128xf32>
    %236 = arith.addf %235, %209 : vector<8x128xf32>
    %c2_109 = arith.constant 2 : index
    %c0_110 = arith.constant 0 : index
    %c0_111 = arith.constant 0 : index
    %237 = vector.load %arg8[%c2_109, %c0_110, %c0_111] : memref<3x1x128xf32, #tpu.memory_space<vmem>>, vector<1x1x128xf32>
    %238 = vector.shape_cast %237 : vector<1x1x128xf32> to vector<1x128xf32>
    %c2_112 = arith.constant 2 : index
    %c0_113 = arith.constant 0 : index
    %c0_114 = arith.constant 0 : index
    %239 = vector.load %arg9[%c2_112, %c0_113, %c0_114] : memref<3x1x128xf32, #tpu.memory_space<vmem>>, vector<1x1x128xf32>
    %240 = vector.shape_cast %239 : vector<1x1x128xf32> to vector<1x128xf32>
    %cst_115 = arith.constant dense<0.000000e+00> : vector<8xf32>
    %241 = vector.multi_reduction <add>, %236, %cst_115 [1] : vector<8x128xf32> to vector<8xf32>
    %242 = vector.shape_cast %241 : vector<8xf32> to vector<8x1xf32>
    %cst_116 = arith.constant 1.280000e+02 : f32
    %243 = vector.broadcast %cst_116 : f32 to vector<8x1xf32>
    %244 = arith.divf %242, %243 : vector<8x1xf32>
    %245 = arith.mulf %236, %236 : vector<8x128xf32>
    %cst_117 = arith.constant dense<0.000000e+00> : vector<8xf32>
    %246 = vector.multi_reduction <add>, %245, %cst_117 [1] : vector<8x128xf32> to vector<8xf32>
    %247 = vector.shape_cast %246 : vector<8xf32> to vector<8x1xf32>
    %cst_118 = arith.constant 1.280000e+02 : f32
    %248 = vector.broadcast %cst_118 : f32 to vector<8x1xf32>
    %249 = arith.divf %247, %248 : vector<8x1xf32>
    %250 = arith.mulf %244, %244 : vector<8x1xf32>
    %251 = arith.subf %249, %250 : vector<8x1xf32>
    %252 = vector.broadcast %244 : vector<8x1xf32> to vector<8x128xf32>
    %253 = arith.subf %236, %252 : vector<8x128xf32>
    %cst_119 = arith.constant 9.99999974E-6 : f32
    %254 = vector.broadcast %cst_119 : f32 to vector<8x1xf32>
    %255 = arith.addf %251, %254 : vector<8x1xf32>
    %256 = math.rsqrt %255 : vector<8x1xf32>
    %257 = vector.broadcast %256 : vector<8x1xf32> to vector<8x128xf32>
    %258 = arith.mulf %253, %257 : vector<8x128xf32>
    %259 = vector.broadcast %238 : vector<1x128xf32> to vector<8x128xf32>
    %260 = arith.mulf %258, %259 : vector<8x128xf32>
    %261 = vector.broadcast %240 : vector<1x128xf32> to vector<8x128xf32>
    %262 = arith.addf %260, %261 : vector<8x128xf32>
    %263 = arith.truncf %262 : vector<8x128xf32> to vector<8x128xbf16>
    %c2_120 = arith.constant 2 : index
    %c0_121 = arith.constant 0 : index
    %c0_122 = arith.constant 0 : index
    %264 = vector.load %arg10[%c2_120, %c0_121, %c0_122] : memref<3x128x256xbf16, #tpu.memory_space<vmem>>, vector<1x128x256xbf16>
    %265 = vector.shape_cast %264 : vector<1x128x256xbf16> to vector<128x256xbf16>
    %cst_123 = arith.constant dense<0.000000e+00> : vector<8x256xf32>
    %266 = tpu.matmul %263, %265, %cst_123 {dimension_numbers = #tpu.dot_dimension_numbers<[1], [0], [0], [1], [0, 0, 1, 1], [], []>} : vector<8x128xbf16>, vector<128x256xbf16>, vector<8x256xf32> -> vector<8x256xf32>
    %c2_124 = arith.constant 2 : index
    %c0_125 = arith.constant 0 : index
    %c0_126 = arith.constant 0 : index
    %267 = vector.load %arg11[%c2_124, %c0_125, %c0_126] : memref<3x1x256xf32, #tpu.memory_space<vmem>>, vector<1x1x256xf32>
    %268 = vector.shape_cast %267 : vector<1x1x256xf32> to vector<1x256xf32>
    %269 = vector.broadcast %268 : vector<1x256xf32> to vector<8x256xf32>
    %270 = arith.addf %266, %269 : vector<8x256xf32>
    %cst_127 = arith.constant 0.000000e+00 : f32
    %271 = vector.broadcast %cst_127 : f32 to vector<8x256xf32>
    %272 = arith.maximumf %270, %271 : vector<8x256xf32>
    %273 = arith.truncf %272 : vector<8x256xf32> to vector<8x256xbf16>
    %c2_128 = arith.constant 2 : index
    %c0_129 = arith.constant 0 : index
    %c0_130 = arith.constant 0 : index
    %274 = vector.load %arg12[%c2_128, %c0_129, %c0_130] : memref<3x256x128xbf16, #tpu.memory_space<vmem>>, vector<1x256x128xbf16>
    %275 = vector.shape_cast %274 : vector<1x256x128xbf16> to vector<256x128xbf16>
    %cst_131 = arith.constant dense<0.000000e+00> : vector<8x128xf32>
    %276 = tpu.matmul %273, %275, %cst_131 {dimension_numbers = #tpu.dot_dimension_numbers<[1], [0], [0], [1], [0, 0, 1, 1], [], []>} : vector<8x256xbf16>, vector<256x128xbf16>, vector<8x128xf32> -> vector<8x128xf32>
    %c2_132 = arith.constant 2 : index
    %c0_133 = arith.constant 0 : index
    %c0_134 = arith.constant 0 : index
    %277 = vector.load %arg13[%c2_132, %c0_133, %c0_134] : memref<3x1x128xf32, #tpu.memory_space<vmem>>, vector<1x1x128xf32>
    %278 = vector.shape_cast %277 : vector<1x1x128xf32> to vector<1x128xf32>
    %279 = vector.broadcast %278 : vector<1x128xf32> to vector<8x128xf32>
    %280 = arith.addf %276, %279 : vector<8x128xf32>
    %281 = arith.truncf %280 : vector<8x128xf32> to vector<8x128xbf16>
    %c2_135 = arith.constant 2 : index
    %c0_136 = arith.constant 0 : index
    %c0_137 = arith.constant 0 : index
    %282 = vector.load %arg14[%c2_135, %c0_136, %c0_137] : memref<3x128x128xbf16, #tpu.memory_space<vmem>>, vector<1x128x128xbf16>
    %283 = vector.shape_cast %282 : vector<1x128x128xbf16> to vector<128x128xbf16>
    %cst_138 = arith.constant dense<0.000000e+00> : vector<8x128xf32>
    %284 = tpu.matmul %281, %283, %cst_138 {dimension_numbers = #tpu.dot_dimension_numbers<[1], [0], [0], [1], [0, 0, 1, 1], [], []>} : vector<8x128xbf16>, vector<128x128xbf16>, vector<8x128xf32> -> vector<8x128xf32>
    %c2_139 = arith.constant 2 : index
    %c0_140 = arith.constant 0 : index
    %c0_141 = arith.constant 0 : index
    %285 = vector.load %arg15[%c2_139, %c0_140, %c0_141] : memref<3x1x128xf32, #tpu.memory_space<vmem>>, vector<1x1x128xf32>
    %286 = vector.shape_cast %285 : vector<1x1x128xf32> to vector<1x128xf32>
    %287 = vector.broadcast %286 : vector<1x128xf32> to vector<8x128xf32>
    %288 = arith.addf %284, %287 : vector<8x128xf32>
    %289 = arith.negf %288 : vector<8x128xf32>
    %290 = math.exp %289 : vector<8x128xf32>
    %cst_142 = arith.constant 1.000000e+00 : f32
    %291 = vector.broadcast %cst_142 : f32 to vector<8x128xf32>
    %292 = arith.addf %291, %290 : vector<8x128xf32>
    %293 = arith.divf %291, %292 : vector<8x128xf32>
    %294 = arith.subf %280, %236 : vector<8x128xf32>
    %295 = arith.mulf %293, %294 : vector<8x128xf32>
    %296 = arith.addf %236, %295 : vector<8x128xf32>
    %297 = arith.truncf %296 : vector<8x128xf32> to vector<8x128xbf16>
    %c0_143 = arith.constant 0 : index
    %c0_144 = arith.constant 0 : index
    %298 = vector.load %arg16[%c0_143, %c0_144] : memref<128x128xbf16, #tpu.memory_space<vmem>>, vector<128x128xbf16>
    %cst_145 = arith.constant dense<0.000000e+00> : vector<8x128xf32>
    %299 = tpu.matmul %297, %298, %cst_145 {dimension_numbers = #tpu.dot_dimension_numbers<[1], [0], [0], [1], [0, 0, 1, 1], [], []>} : vector<8x128xbf16>, vector<128x128xbf16>, vector<8x128xf32> -> vector<8x128xf32>
    %c0_146 = arith.constant 0 : index
    %c0_147 = arith.constant 0 : index
    %300 = vector.load %arg17[%c0_146, %c0_147] : memref<1x128xf32, #tpu.memory_space<vmem>>, vector<1x128xf32>
    %301 = vector.broadcast %300 : vector<1x128xf32> to vector<8x128xf32>
    %302 = arith.addf %299, %301 : vector<8x128xf32>
    %303 = arith.negf %302 : vector<8x128xf32>
    %304 = math.exp %303 : vector<8x128xf32>
    %cst_148 = arith.constant 1.000000e+00 : f32
    %305 = vector.broadcast %cst_148 : f32 to vector<8x128xf32>
    %306 = arith.addf %305, %304 : vector<8x128xf32>
    %307 = arith.divf %305, %306 : vector<8x128xf32>
    %308 = arith.truncf %307 : vector<8x128xf32> to vector<8x128xbf16>
    %c0_149 = arith.constant 0 : index
    %c0_150 = arith.constant 0 : index
    %309 = vector.load %arg18[%c0_149, %c0_150] : memref<128x128xbf16, #tpu.memory_space<vmem>>, vector<128x128xbf16>
    %cst_151 = arith.constant dense<0.000000e+00> : vector<8x128xf32>
    %310 = tpu.matmul %308, %309, %cst_151 {dimension_numbers = #tpu.dot_dimension_numbers<[1], [0], [0], [1], [0, 0, 1, 1], [], []>} : vector<8x128xbf16>, vector<128x128xbf16>, vector<8x128xf32> -> vector<8x128xf32>
    %c0_152 = arith.constant 0 : index
    %c0_153 = arith.constant 0 : index
    %311 = vector.load %arg19[%c0_152, %c0_153] : memref<1x128xf32, #tpu.memory_space<vmem>>, vector<1x128xf32>
    %312 = vector.broadcast %311 : vector<1x128xf32> to vector<8x128xf32>
    %313 = arith.addf %310, %312 : vector<8x128xf32>
    %314 = math.tanh %313 : vector<8x128xf32>
    %315 = arith.truncf %314 : vector<8x128xf32> to vector<8x128xbf16>
    %316 = tpu.concatenate %297, %315 in 1 : vector<8x128xbf16>, vector<8x128xbf16> -> vector<8x256xbf16>
    %c0_154 = arith.constant 0 : index
    %c0_155 = arith.constant 0 : index
    %317 = vector.load %arg20[%c0_154, %c0_155] : memref<256x128xbf16, #tpu.memory_space<vmem>>, vector<256x128xbf16>
    %cst_156 = arith.constant dense<0.000000e+00> : vector<8x128xf32>
    %318 = tpu.matmul %316, %317, %cst_156 {dimension_numbers = #tpu.dot_dimension_numbers<[1], [0], [0], [1], [0, 0, 1, 1], [], []>} : vector<8x256xbf16>, vector<256x128xbf16>, vector<8x128xf32> -> vector<8x128xf32>
    %c0_157 = arith.constant 0 : index
    %c0_158 = arith.constant 0 : index
    %319 = vector.load %arg21[%c0_157, %c0_158] : memref<1x128xf32, #tpu.memory_space<vmem>>, vector<1x128xf32>
    %320 = vector.broadcast %319 : vector<1x128xf32> to vector<8x128xf32>
    %321 = arith.addf %318, %320 : vector<8x128xf32>
    %cst_159 = arith.constant 0.000000e+00 : f32
    %322 = vector.broadcast %cst_159 : f32 to vector<8x128xf32>
    %323 = arith.maximumf %321, %322 : vector<8x128xf32>
    %324 = arith.truncf %323 : vector<8x128xf32> to vector<8x128xbf16>
    %c0_160 = arith.constant 0 : index
    %c0_161 = arith.constant 0 : index
    %325 = vector.load %arg22[%c0_160, %c0_161] : memref<128x128xbf16, #tpu.memory_space<vmem>>, vector<128x128xbf16>
    %cst_162 = arith.constant dense<0.000000e+00> : vector<8x128xf32>
    %326 = tpu.matmul %324, %325, %cst_162 {dimension_numbers = #tpu.dot_dimension_numbers<[1], [0], [0], [1], [0, 0, 1, 1], [], []>} : vector<8x128xbf16>, vector<128x128xbf16>, vector<8x128xf32> -> vector<8x128xf32>
    %c0_163 = arith.constant 0 : index
    %c0_164 = arith.constant 0 : index
    %327 = vector.load %arg23[%c0_163, %c0_164] : memref<1x128xf32, #tpu.memory_space<vmem>>, vector<1x128xf32>
    %328 = vector.broadcast %327 : vector<1x128xf32> to vector<8x128xf32>
    %329 = arith.addf %326, %328 : vector<8x128xf32>
    %c0_165 = arith.constant 0 : index
    %c0_166 = arith.constant 0 : index
    %330 = vector.load %arg24[%c0_165, %c0_166] : memref<8x128xf32, #tpu.memory_space<vmem>>, vector<8x128xf32>
    tpu.vector_store %arg24[%c0_165, %c0_166], %329 {strides = array<i32>} : memref<8x128xf32, #tpu.memory_space<vmem>>, vector<8x128xf32>,
    return
  }
  func.func @transform_0(%arg0: i32) -> (i32, i32) {
    %c0_i32 = arith.constant 0 : i32
    %c0_i32_0 = arith.constant 0 : i32
    return %arg0, %c0_i32 : i32, i32
  }
  func.func @transform_1(%arg0: i32) -> (i32, i32) {
    %c0_i32 = arith.constant 0 : i32
    %c0_i32_0 = arith.constant 0 : i32
    %c0_i32_1 = arith.constant 0 : i32
    return %c0_i32, %c0_i32_0 : i32, i32
  }
  func.func @transform_2(%arg0: i32) -> (i32, i32) {
    %c0_i32 = arith.constant 0 : i32
    %c0_i32_0 = arith.constant 0 : i32
    %c0_i32_1 = arith.constant 0 : i32
    return %c0_i32, %c0_i32_0 : i32, i32
  }
  func.func @transform_3(%arg0: i32) -> (i32, i32) {
    %c0_i32 = arith.constant 0 : i32
    %c0_i32_0 = arith.constant 0 : i32
    %c0_i32_1 = arith.constant 0 : i32
    return %c0_i32, %c0_i32_0 : i32, i32
  }
  func.func @transform_4(%arg0: i32) -> (i32, i32) {
    %c0_i32 = arith.constant 0 : i32
    %c0_i32_0 = arith.constant 0 : i32
    %c0_i32_1 = arith.constant 0 : i32
    return %c0_i32, %c0_i32_0 : i32, i32
  }
  func.func @transform_5(%arg0: i32) -> (i32, i32, i32) {
    %c0_i32 = arith.constant 0 : i32
    %c0_i32_0 = arith.constant 0 : i32
    %c0_i32_1 = arith.constant 0 : i32
    %c0_i32_2 = arith.constant 0 : i32
    return %c0_i32, %c0_i32_0, %c0_i32_1 : i32, i32, i32
  }
  func.func @transform_6(%arg0: i32) -> (i32, i32, i32) {
    %c0_i32 = arith.constant 0 : i32
    %c0_i32_0 = arith.constant 0 : i32
    %c0_i32_1 = arith.constant 0 : i32
    %c0_i32_2 = arith.constant 0 : i32
    return %c0_i32, %c0_i32_0, %c0_i32_1 : i32, i32, i32
  }
  func.func @transform_7(%arg0: i32) -> (i32, i32, i32) {
    %c0_i32 = arith.constant 0 : i32
    %c0_i32_0 = arith.constant 0 : i32
    %c0_i32_1 = arith.constant 0 : i32
    %c0_i32_2 = arith.constant 0 : i32
    return %c0_i32, %c0_i32_0, %c0_i32_1 : i32, i32, i32
  }
  func.func @transform_8(%arg0: i32) -> (i32, i32, i32) {
    %c0_i32 = arith.constant 0 : i32
    %c0_i32_0 = arith.constant 0 : i32
    %c0_i32_1 = arith.constant 0 : i32
    %c0_i32_2 = arith.constant 0 : i32
    return %c0_i32, %c0_i32_0, %c0_i32_1 : i32, i32, i32
  }
  func.func @transform_9(%arg0: i32) -> (i32, i32, i32) {
    %c0_i32 = arith.constant 0 : i32
    %c0_i32_0 = arith.constant 0 : i32
    %c0_i32_1 = arith.constant 0 : i32
    %c0_i32_2 = arith.constant 0 : i32
    return %c0_i32, %c0_i32_0, %c0_i32_1 : i32, i32, i32
  }
  func.func @transform_10(%arg0: i32) -> (i32, i32, i32) {
    %c0_i32 = arith.constant 0 : i32
    %c0_i32_0 = arith.constant 0 : i32
    %c0_i32_1 = arith.constant 0 : i32
    %c0_i32_2 = arith.constant 0 : i32
    return %c0_i32, %c0_i32_0, %c0_i32_1 : i32, i32, i32
  }
  func.func @transform_11(%arg0: i32) -> (i32, i32, i32) {
    %c0_i32 = arith.constant 0 : i32
    %c0_i32_0 = arith.constant 0 : i32
    %c0_i32_1 = arith.constant 0 : i32
    %c0_i32_2 = arith.constant 0 : i32
    return %c0_i32, %c0_i32_0, %c0_i32_1 : i32, i32, i32
  }
  func.func @transform_12(%arg0: i32) -> (i32, i32, i32) {
    %c0_i32 = arith.constant 0 : i32
    %c0_i32_0 = arith.constant 0 : i32
    %c0_i32_1 = arith.constant 0 : i32
    %c0_i32_2 = arith.constant 0 : i32
    return %c0_i32, %c0_i32_0, %c0_i32_1 : i32, i32, i32
  }
  func.func @transform_13(%arg0: i32) -> (i32, i32, i32) {
    %c0_i32 = arith.constant 0 : i32
    %c0_i32_0 = arith.constant 0 : i32
    %c0_i32_1 = arith.constant 0 : i32
    %c0_i32_2 = arith.constant 0 : i32
    return %c0_i32, %c0_i32_0, %c0_i32_1 : i32, i32, i32
  }
  func.func @transform_14(%arg0: i32) -> (i32, i32, i32) {
    %c0_i32 = arith.constant 0 : i32
    %c0_i32_0 = arith.constant 0 : i32
    %c0_i32_1 = arith.constant 0 : i32
    %c0_i32_2 = arith.constant 0 : i32
    return %c0_i32, %c0_i32_0, %c0_i32_1 : i32, i32, i32
  }
  func.func @transform_15(%arg0: i32) -> (i32, i32) {
    %c0_i32 = arith.constant 0 : i32
    %c0_i32_0 = arith.constant 0 : i32
    %c0_i32_1 = arith.constant 0 : i32
    return %c0_i32, %c0_i32_0 : i32, i32
  }
  func.func @transform_16(%arg0: i32) -> (i32, i32) {
    %c0_i32 = arith.constant 0 : i32
    %c0_i32_0 = arith.constant 0 : i32
    %c0_i32_1 = arith.constant 0 : i32
    return %c0_i32, %c0_i32_0 : i32, i32
  }
  func.func @transform_17(%arg0: i32) -> (i32, i32) {
    %c0_i32 = arith.constant 0 : i32
    %c0_i32_0 = arith.constant 0 : i32
    %c0_i32_1 = arith.constant 0 : i32
    return %c0_i32, %c0_i32_0 : i32, i32
  }
  func.func @transform_18(%arg0: i32) -> (i32, i32) {
    %c0_i32 = arith.constant 0 : i32
    %c0_i32_0 = arith.constant 0 : i32
    %c0_i32_1 = arith.constant 0 : i32
    return %c0_i32, %c0_i32_0 : i32, i32
  }
  func.func @transform_19(%arg0: i32) -> (i32, i32) {
    %c0_i32 = arith.constant 0 : i32
    %c0_i32_0 = arith.constant 0 : i32
    %c0_i32_1 = arith.constant 0 : i32
    return %c0_i32, %c0_i32_0 : i32, i32
  }
  func.func @transform_20(%arg0: i32) -> (i32, i32) {
    %c0_i32 = arith.constant 0 : i32
    %c0_i32_0 = arith.constant 0 : i32
    %c0_i32_1 = arith.constant 0 : i32
    return %c0_i32, %c0_i32_0 : i32, i32
  }
  func.func @transform_21(%arg0: i32) -> (i32, i32) {
    %c0_i32 = arith.constant 0 : i32
    %c0_i32_0 = arith.constant 0 : i32
    %c0_i32_1 = arith.constant 0 : i32
    return %c0_i32, %c0_i32_0 : i32, i32
  }
  func.func @transform_22(%arg0: i32) -> (i32, i32) {
    %c0_i32 = arith.constant 0 : i32
    %c0_i32_0 = arith.constant 0 : i32
    %c0_i32_1 = arith.constant 0 : i32
    return %c0_i32, %c0_i32_0 : i32, i32
  }
  func.func @transform_23(%arg0: i32) -> (i32, i32) {
    %c0_i32 = arith.constant 0 : i32
    %c0_i32_0 = arith.constant 0 : i32
    return %arg0, %c0_i32 : i32, i32
  }
}

</mosaic_0001>

<bundles_post_ra>
// kernel: enhanced_reasoning_forward.1
= control target key start
LH: loop header
LB: loop body
LE: loop exit
PB: predicated region body
PF: predicated region fallthrough
CT: control target
= control target key end

     0   :  { %s3803_s0 = inlined_call_operand.vmem [shape: f32[8,4], index: 0, kind: input, shape index: {}]   ;;  %s3804_s1 = inlined_call_operand.vmem [shape: f32[4,128], index: 1, kind: input, shape index: {}]   ;;  %s3805_s2 = inlined_call_operand.hbm [shape: f32[1,128], index: 2, kind: input, shape index: {}]   ;;  %s3806_s3 = inlined_call_operand.hbm [shape: bf16[128,128], index: 3, kind: input, shape index: {}]   ;;  %s3807_s4 = inlined_call_operand.hbm [shape: f32[1,128], index: 4, kind: input, shape index: {}]   ;;  %s3808_s5 = inlined_call_operand.vmem [shape: f32[3,1,128], index: 5, kind: input, shape index: {}]   ;;  %s3809_s6 = inlined_call_operand.vmem [shape: f32[3,1,128], index: 6, kind: input, shape index: {}]   ;;  %s3810_s7 = inlined_call_operand.vmem [shape: f32[3,1,128], index: 7, kind: input, shape index: {}]   ;;  %s3811_s8 = inlined_call_operand.vmem [shape: f32[3,1,128], index: 8, kind: input, shape index: {}]   ;;  %s3812_s9 = inlined_call_operand.hbm [shape: bf16[3,128,256], index: 9, kind: input, shape index: {}]   ;;  %s3813_s10 = inlined_call_operand.vmem [shape: f32[3,1,256], index: 10, kind: input, shape index: {}]   ;;  %s3814_s11 = inlined_call_operand.hbm [shape: bf16[3,256,128], index: 11, kind: input, shape index: {}]   ;;  %s3815_s12 = inlined_call_operand.hbm [shape: f32[3,1,128], index: 12, kind: input, shape index: {}]   ;;  %s3816_s13 = inlined_call_operand.hbm [shape: bf16[3,128,128], index: 13, kind: input, shape index: {}]   ;;  %s3817_s14 = inlined_call_operand.hbm [shape: f32[3,1,128], index: 14, kind: input, shape index: {}]   ;;  %s3818_s15 = inlined_call_operand.hbm [shape: bf16[128,128], index: 15, kind: input, shape index: {}]   ;;  %s3819_s16 = inlined_call_operand.vmem [shape: f32[1,128], index: 16, kind: input, shape index: {}]   ;;  %s3820_s17 = inlined_call_operand.hbm [shape: bf16[128,128], index: 17, kind: input, shape index: {}]   ;;  %s3821_s18 = inlined_call_operand.vmem [shape: f32[1,128], index: 18, kind: input, shape index: {}]   ;;  %s3822_s19 = inlined_call_operand.hbm [shape: bf16[256,128], index: 19, kind: input, shape index: {}]   ;;  %s3823_s20 = inlined_call_operand.vmem [shape: f32[1,128], index: 20, kind: input, shape index: {}]   ;;  %s3824_s21 = inlined_call_operand.hbm [shape: bf16[128,128], index: 21, kind: input, shape index: {}]   ;;  %s3825_s22 = inlined_call_operand.hbm [shape: f32[1,128], index: 22, kind: input, shape index: {}]   ;;  %s3826_s23 = inlined_call_operand.vmem [shape: f32[8,128], index: 23, kind: output, shape index: {}]  }
   0x1   :  { %3834 = sst [smem:[#allocation29_spill]] %s3803_s0 }
   0x2   :  { %3835 = sst [smem:[#allocation30_spill]] %s3804_s1 }
   0x3   :  { %3836 = sst [smem:[#allocation31_spill]] %s3805_s2 }
   0x4   :  { %3837 = sst [smem:[#allocation32_spill]] %s3806_s3 }
   0x5   :  { %3838 = sst [smem:[#allocation33_spill]] %s3807_s4 }
   0x6   :  { %3839 = sst [smem:[#allocation34_spill]] %s3808_s5 }
   0x7   :  { %3840 = sst [smem:[#allocation35_spill]] %s3809_s6 }
   0x8   :  { %3841 = sst [smem:[#allocation36_spill]] %s3810_s7 }
   0x9   :  { %3842 = sst [smem:[#allocation37_spill]] %s3826_s23 }
   0xa   :  { %28 = vsyncpa [#allocation3], 0 }
   0xb   :  { %29 = vsyncpa [#allocation5], 0 }
   0xc   :  { %30 = vsyncpa [#allocation8], 0 }
   0xd   :  { %31 = vsyncpa [#allocation11], 0 }
   0xe   :  { %32 = vsyncpa [#allocation14], 0 }
   0xf   :  { %33 = vsyncpa [#allocation17], 0  ;;  %s3843_s24 = sld [smem:[#allocation32_spill]] }
  0x15   :  { %s54_s25 = sshll.u32 %s3843_s24, 4  ;;  %s55_s25 = int_to_ptr.hbm [resolvable:$true] %s54_s25 }
  0x16   :  { %34 = vsyncpa [#allocation20], 0  ;;  %s3498_s5 = smov [#allocation4]   ;;  %s86_s6 = sshll.u32 %s3812_s9, 4  ;;  %s87_s6 = int_to_ptr.hbm [resolvable:$true] %s86_s6 }
  0x17   :  { %s56_s1 = sshll.u32 %s3498_s5, 4  ;;  %s3830_s27 = smov 64   ;;  %s57_s1 = int_to_ptr.vmem [resolvable:$true] %s56_s1 }
  0x18   :  { %s3832_s7 = smov 4   ;;  %s3501_s28 = smov [#allocation7]  }
  0x19   :  { %62 = dma.hbm_to_vmem [thread:$0]  %s55_s25, 1024, %s57_s1, [#allocation5], %s3830_s27, %s3830_s27, %s3832_s7  }
  0x1a   :  { %s88_s29 = sshll.u32 %s3501_s28, 4  ;;  %s3502_s3 = smov 128   ;;  %s89_s29 = int_to_ptr.vmem [resolvable:$true] %s88_s29 }
  0x1b   :  { %s3503_s0 = smov 8   ;;  %s114_s24 = sshll.u32 %s3815_s12, 4  ;;  %s115_s24 = int_to_ptr.hbm [resolvable:$true] %s114_s24 }
  0x1c   :  { %94 = dma.hbm_to_vmem [thread:$0]  %s87_s6, 6144, %s89_s29, [#allocation8], %s3502_s3, %s3502_s3, %s3503_s0  }
  0x1d   :  { %s3504_s5 = smov [#allocation10]   ;;  %s140_s23 = sshll.u32 %s3817_s14, 4  ;;  %s141_s23 = int_to_ptr.hbm [resolvable:$true] %s140_s23 }
  0x1e   :  { %s116_s9 = sshll.u32 %s3504_s5, 4  ;;  %s3505_s25 = smov 16   ;;  %s117_s9 = int_to_ptr.vmem [resolvable:$true] %s116_s9 }
  0x1f   :  { %s3506_s1 = smov 1   ;;  %s3507_s28 = smov [#allocation13]  }
  0x20   :  { %122 = dma.hbm_to_vmem [thread:$0]  %s115_s24, 48, %s117_s9, [#allocation11], %s3505_s25, %s3505_s25, %s3506_s1  }
  0x21   :  { %s142_s27 = sshll.u32 %s3507_s28, 4  ;;  %s168_s29 = sshll.u32 %s3820_s17, 4  ;;  %s143_s27 = int_to_ptr.vmem [resolvable:$true] %s142_s27  ;;  %s169_s29 = int_to_ptr.hbm [resolvable:$true] %s168_s29 }
  0x22   :  { %148 = dma.hbm_to_vmem [thread:$0]  %s141_s23, 48, %s143_s27, [#allocation14], %s3505_s25, %s3505_s25, %s3506_s1  }
  0x23   :  { %s198_s0 = sshll.u32 %s3824_s21, 4  ;;  %s3508_s4 = smov [#allocation16]   ;;  %s199_s0 = int_to_ptr.hbm [resolvable:$true] %s198_s0 }
  0x24   :  { %s170_s30 = sshll.u32 %s3508_s4, 4  ;;  %s3844_s14 = smov 4   ;;  %s171_s30 = int_to_ptr.vmem [resolvable:$true] %s170_s30 }
  0x25   :  { %s3845_s24 = smov 64   ;;  %s3509_s5 = smov [#allocation19]  }
  0x26   :  { %176 = dma.hbm_to_vmem [thread:$0]  %s169_s29, 1024, %s171_s30, [#allocation17], %s3845_s24, %s3845_s24, %s3844_s14  }
  0x27   :  { %s200_s9 = sshll.u32 %s3509_s5, 4  ;;  %s3846_s17 = sld [smem:[#allocation31_spill]]  ;;  %s201_s9 = int_to_ptr.vmem [resolvable:$true] %s200_s9 }
  0x28   :  { %206 = dma.hbm_to_vmem [thread:$0]  %s199_s0, 1024, %s201_s9, [#allocation20], %s3845_s24, %s3845_s24, %s3844_s14  }
  0x29   :  { %s3847_s27 = sld [smem:[#allocation33_spill]]  ;;  %s3510_s1 = smov [#allocation2]  }
  0x2a   :  { %s46_s28 = sshll.u32 %s3510_s1, 4  ;;  %s3511_s6 = smov [#allocation6]   ;;  %s47_s28 = int_to_ptr.vmem [resolvable:$true] %s46_s28 }
  0x2b   :  { %s70_s29 = sshll.u32 %s3511_s6, 4  ;;  %s101_s4 = sshll.u32 %s3814_s11, 4  ;;  %s71_s29 = int_to_ptr.vmem [resolvable:$true] %s70_s29  ;;  %s102_s4 = int_to_ptr.hbm [resolvable:$true] %s101_s4 }
  0x2c   :  { %s127_s5 = sshll.u32 %s3816_s13, 4  ;;  %s3512_s9 = smov [#allocation9]   ;;  %s128_s5 = int_to_ptr.hbm [resolvable:$true] %s127_s5 }
  0x2d   :  { %s44_s2 = sshll.u32 %s3846_s17, 4  ;;  %s103_s26 = sshll.u32 %s3512_s9, 4  ;;  %s45_s2 = int_to_ptr.hbm [resolvable:$true] %s44_s2  ;;  %s104_s26 = int_to_ptr.vmem [resolvable:$true] %s103_s26 }
  0x2e   :  { %49 = dma.hbm_to_vmem [thread:$0]  %s45_s2, 16, %s47_s28, [#allocation3]  }
  0x2f   :  { %s68_s25 = sshll.u32 %s3847_s27, 4  ;;  %s3513_s7 = smov [#allocation12]   ;;  %s69_s25 = int_to_ptr.hbm [resolvable:$true] %s68_s25 }
  0x30   :  { %73 = dma.hbm_to_vmem [thread:$0]  %s69_s25, 16, %s71_s29, [#allocation5]  }
  0x31   :  { %109 = dma.hbm_to_vmem [thread:$0]  %s102_s4, 6144, %s104_s26, [#allocation8], %s3845_s24, %s3845_s24, %s3844_s14  }
  0x32   :  { %s129_s17 = sshll.u32 %s3513_s7, 4  ;;  %s153_s11 = sshll.u32 %s3818_s15, 4  ;;  %s130_s17 = int_to_ptr.vmem [resolvable:$true] %s129_s17  ;;  %s154_s11 = int_to_ptr.hbm [resolvable:$true] %s153_s11 }
  0x33   :  { %135 = dma.hbm_to_vmem [thread:$0]  %s128_s5, 3072, %s130_s17, [#allocation11], %s3845_s24, %s3845_s24, %s3844_s14  }
  0x34   :  { %s183_s27 = sshll.u32 %s3822_s19, 4  ;;  %s3514_s25 = smov [#allocation15]   ;;  %s184_s27 = int_to_ptr.hbm [resolvable:$true] %s183_s27 }
  0x35   :  { %s155_s1 = sshll.u32 %s3514_s25, 4  ;;  %s3515_s28 = smov [#allocation18]   ;;  %s156_s1 = int_to_ptr.vmem [resolvable:$true] %s155_s1 }
  0x36   :  { %161 = dma.hbm_to_vmem [thread:$0]  %s154_s11, 1024, %s156_s1, [#allocation14], %s3845_s24, %s3845_s24, %s3844_s14  }
  0x37   :  { %s185_s15 = sshll.u32 %s3515_s28, 4  ;;  %s212_s12 = sshll.u32 %s3825_s22, 4  ;;  %s186_s15 = int_to_ptr.vmem [resolvable:$true] %s185_s15  ;;  %s213_s12 = int_to_ptr.hbm [resolvable:$true] %s212_s12 }
  0x38   :  { %191 = dma.hbm_to_vmem [thread:$0]  %s184_s27, 2048, %s186_s15, [#allocation17], %s3845_s24, %s3845_s24, %s3844_s14  }
  0x39   :  { %s3516_s19 = smov [#allocation21]  }
  0x3a   :  { %s214_s3 = sshll.u32 %s3516_s19, 4  ;;  %s215_s3 = int_to_ptr.vmem [resolvable:$true] %s214_s3 }
  0x3b   :  { %217 = dma.hbm_to_vmem [thread:$0]  %s213_s12, 16, %s215_s3, [#allocation20]  }
  0x3c   :  { %3484 = dma.done.wait [#allocation3], 16  }
  0x3d   :  { %3485 = vsyncadd [#allocation3], 4294967280 }
  0x3e   :  { %3486 = dma.done.wait [#allocation5], 1040  }
  0x3f   :  { %3487 = vsyncadd [#allocation5], 4294966256 }
  0x40   :  { %3488 = dma.done.wait [#allocation8], 12288  }
  0x41   :  { %3489 = vsyncadd [#allocation8], 4294955008 }
  0x42   :  { %3490 = dma.done.wait [#allocation11], 3120  }
  0x43   :  { %3491 = vsyncadd [#allocation11], 4294964176 }
  0x44   :  { %3492 = dma.done.wait [#allocation14], 1072  }
  0x45   :  { %3493 = vsyncadd [#allocation14], 4294966224 }
  0x46   :  { %3494 = dma.done.wait [#allocation17], 3072  }
  0x47   :  { %3495 = vsyncadd [#allocation17], 4294964224 }
  0x48   :  { %3496 = dma.done.wait [#allocation20], 1040  }
  0x49   :  { %3497 = vsyncadd [#allocation20], 4294966256  ;;  %v3517_v0 = vmov 0   ;;  %v3518_v1 = vmov 2   ;;  %s3848_s24 = sld [smem:[#allocation29_spill]]  ;;  %v2926_v3 = vld [vmem:[#allocation4 + $0x38] sm:$0xff] }
  0x4a   :  { %3111 = vset.pattern.permute.xlu0 %v3517_v0  ;;  %3113 = vset.pattern.permute.xlu1 %v3518_v1  ;;  %v2925_v4 = vld [vmem:[#allocation4 + $0x30] sm:$0xff]  ;;  %v2924_v5 = vld [vmem:[#allocation4 + $0x28] sm:$0xff]  ;;  %v3519_v6 = vmov 1   ;;  %v3520_v7 = vmov 3   ;;  %v2923_v8 = vld [vmem:[#allocation4 + $0x20] sm:$0xff]  ;;  %s3849_s0 = sld [smem:[#allocation30_spill]] }
  0x4b   :  { %375 = vmatpush.bf16.msra.mxu0 %v2926_v3  ;;  %v2922_v9 = vld [vmem:[#allocation4 + $0x18] sm:$0xff]  ;;  %v2921_v10 = vld [vmem:[#allocation4 + $0x10] sm:$0xff]  ;;  %v2920_v11 = vld [vmem:[#allocation4 + $0x8] sm:$0xff]  ;;  %v3521_v38 = vmov 128.0   ;;  %s3850_s26 = sld [smem:[#allocation34_spill]] }
  0x4c   :  { %v2919_v12 = vld [vmem:[#allocation4] sm:$0xff]  ;;  %v3116_v17 = vld [vmem:[#allocation2] ss:$0 sm:$0xff]  ;;  %3140 = vrcp.f32 %v3521_v38  ;;  %s3851_s2 = sld [smem:[#allocation35_spill]]  ;;  %v2323_v3 = vld [vmem:[#allocation7 + $0x70] sm:$0xf] }
  0x4d   :  { %v3117_v33 = vld [vmem:[#allocation6] ss:$0 sm:$0xff]  ;;  %v2275_v38 = vld [vmem:[#allocation7 + $0x10] sm:$0xf]  ;;  %s3852_s13 = sld [smem:[#allocation36_spill]] }
  0x4e   :  { %s3853_s25 = sld [smem:[#allocation37_spill]] }
  0x4f   :  { %v270_v2 = vld [vmem:[%s3848_s24] sm:$0xff]  ;;  %376 = vmatpush.bf16.msra.mxu0 %v2925_v4  ;;  %v2942_v4 = vld [vmem:[#allocation7 + $0x74] sm:$0xf0] }
  0x50   :  { %275 = vperm.xlu0 %3111, %v270_v2   ;;  %292 = vperm.xlu1 %3113, %v270_v2   ;;  %v271_v13 = vld [vmem:[%s3849_s0] sm:$0xf] }
  0x51   :  { %v278_v16 = vperm.slane %v271_v13, 0  ;;  %v288_v19 = vperm.slane %v271_v13, 1  ;;  %v295_v20 = vperm.slane %v271_v13, 2  ;;  %v302_v21 = vperm.slane %v271_v13, 3  ;;  %v3118_v59 = vld [vmem:[%s3850_s26] ss:$0 sm:$0xff] }
  0x52   :  { %v3141_v39 = vpop.eup %3140  ;;  %v3119_v62 = vld [vmem:[%s3851_s2] ss:$0 sm:$0xff]  ;;  %v2317_v13 = vld [vmem:[#allocation7 + $0x68] sm:$0xf0] }
  0x53   :  { %377 = vmatpush.bf16.msra.mxu0 %v2924_v5  ;;  %v393_v40 = vmul.f32 128.0, %v3141_v39  ;;  %vm397_vm0 = vweird.f32 %v3141_v39  ;;  %v2941_v5 = vld [vmem:[#allocation7 + $0x74] sm:$0xf] }
  0x55   :  { %v394_v41 = vsub.f32 1.0, %v393_v40 }
  0x57   :  { %378 = vmatpush.bf16.msra.mxu0 %v2923_v8  ;;  %v395_v42 = vmul.f32 %v3141_v39, %v394_v41  ;;  %v2929_v41 = vld [vmem:[#allocation7 + $0x14] sm:$0xf] }
  0x58   :  { %3112 = vset.pattern.permute.xlu0 %v3519_v6  ;;  %3114 = vset.pattern.permute.xlu1 %v3520_v7  ;;  %v2324_v6 = vor.u32 %v2942_v4, %v2323_v3  ;;  %v2955_v3 = vld [vmem:[#allocation9 + $0x60] sm:$0xff] }
  0x59   :  { %285 = vperm.xlu0 %3112, %v270_v2   ;;  %299 = vperm.xlu1 %3114, %v270_v2   ;;  %v396_v43 = vadd.f32 %v3141_v39, %v395_v42  ;;  %v2277_v42 = vld [vmem:[#allocation7 + $0x18] sm:$0xf0] }
  0x5a   :  { %563 = vmatpush.bf16.msra.mxu1 %v2324_v6  ;;  %v2946_v6 = vld [vmem:[#allocation9 + $0x18] sm:$0xff] }
  0x5b   :  { %379 = vmatpush.bf16.msra.mxu0 %v2922_v9  ;;  %v3708_v45 = vsel %vm397_vm0, %v3141_v39, %v396_v43  ;;  %v2315_v9 = vld [vmem:[#allocation7 + $0x60] sm:$0xf]  ;;  %v2930_v39 = vld [vmem:[#allocation7 + $0x14] sm:$0xf0] }
  0x5c   :  { %v2276_v43 = vor.u32 %v2930_v39, %v2275_v38 }
  0x5f   :  { %380 = vmatpush.bf16.msra.mxu0 %v2921_v10  ;;  %v2940_v10 = vld [vmem:[#allocation7 + $0x64] sm:$0xf0] }
  0x61   :  { %3115 = vset.pattern.permute.xlu0 %v3520_v7  ;;  %v2325_v7 = vld [vmem:[#allocation7 + $0x78] sm:$0xf0] }
  0x62   :  { %v2328_v8 = vor.u32 %v2941_v5, %v2325_v7  ;;  %v2954_v7 = vld [vmem:[#allocation9 + $0x58] sm:$0xff] }
  0x63   :  { %381 = vmatpush.bf16.msra.mxu0 %v2920_v11  ;;  %v2939_v11 = vld [vmem:[#allocation7 + $0x64] sm:$0xf] }
  0x64   :  { %576 = vmatpush.bf16.msra.mxu2 %v2328_v8 }
  0x67   :  { %382 = vmatpush.bf16.msra.mxu0 %v2919_v12  ;;  %v2316_v12 = vor.u32 %v2940_v10, %v2315_v9  ;;  %v2945_v10 = vld [vmem:[#allocation9 + $0x10] sm:$0xff] }
  0x69   :  { %564 = vmatpush.bf16.msra.mxu1 %v2316_v12 }
  0xc2   :  { %v276_v14 = vpop.permute.xlu0 %275  ;;  %v293_v15 = vpop.permute.xlu1 %292 }
  0xc3   :  { %v279_v18 = vmul.f32 %v278_v16, %v276_v14  ;;  %v296_v26 = vmul.f32 %v295_v20, %v293_v15  ;;  %v2320_v14 = vor.u32 %v2939_v11, %v2317_v13  ;;  %v2307_v15 = vld [vmem:[#allocation7 + $0x50] sm:$0xf]  ;;  %v2938_v16 = vld [vmem:[#allocation7 + $0x54] sm:$0xf0] }
  0xc5   :  { %v283_v24 = vadd.f32 %v3116_v17, %v279_v18  ;;  %577 = vmatpush.bf16.msra.mxu2 %v2320_v14  ;;  %v2937_v17 = vld [vmem:[#allocation7 + $0x54] sm:$0xf]  ;;  %v2308_v18 = vor.u32 %v2938_v16, %v2307_v15  ;;  %v3120_v14 = vld [vmem:[%s3852_s13] ss:$0 sm:$0xff] }
  0xc7   :  { %565 = vmatpush.bf16.msra.mxu1 %v2308_v18 }
  0xcb   :  { %v286_v22 = vpop.permute.xlu0 %285  ;;  %v300_v23 = vpop.permute.xlu1 %299 }
  0xcc   :  { %v289_v25 = vmul.f32 %v288_v19, %v286_v22  ;;  %v303_v28 = vmul.f32 %v302_v21, %v300_v23  ;;  %v2309_v19 = vld [vmem:[#allocation7 + $0x58] sm:$0xf0]  ;;  %v2299_v21 = vld [vmem:[#allocation7 + $0x40] sm:$0xf]  ;;  %v2936_v22 = vld [vmem:[#allocation7 + $0x44] sm:$0xf0] }
  0xcd   :  { %v2312_v20 = vor.u32 %v2937_v17, %v2309_v19  ;;  %v2935_v23 = vld [vmem:[#allocation7 + $0x44] sm:$0xf]  ;;  %v3121_v17 = vld [vmem:[%s3811_s8] ss:$0 sm:$0xff] }
  0xce   :  { %v290_v27 = vadd.f32 %v289_v25, %v283_v24  ;;  %v2300_v24 = vor.u32 %v2936_v22, %v2299_v21  ;;  %v2301_v25 = vld [vmem:[#allocation7 + $0x48] sm:$0xf0]  ;;  %v2953_v22 = vld [vmem:[#allocation9 + $0x50] sm:$0xff] }
  0xcf   :  { %578 = vmatpush.bf16.msra.mxu2 %v2312_v20  ;;  %v2944_v21 = vld [vmem:[#allocation9 + $0x8] sm:$0xff] }
  0xd0   :  { %v297_v29 = vadd.f32 %v296_v26, %v290_v27  ;;  %v2304_v26 = vor.u32 %v2935_v23, %v2301_v25  ;;  %566 = vmatpush.bf16.msra.mxu1 %v2300_v24  ;;  %v2291_v27 = vld [vmem:[#allocation7 + $0x30] sm:$0xf]  ;;  %v2943_v23 = vld [vmem:[#allocation9] sm:$0xff]  ;;  %v2952_v24 = vld [vmem:[#allocation9 + $0x48] sm:$0xff] }
  0xd1   :  { %v2951_v25 = vld [vmem:[#allocation9 + $0x40] sm:$0xff] }
  0xd2   :  { %v304_v30 = vadd.f32 %v303_v28, %v297_v29  ;;  %v2934_v28 = vld [vmem:[#allocation7 + $0x34] sm:$0xf0]  ;;  %v2933_v29 = vld [vmem:[#allocation7 + $0x34] sm:$0xf] }
  0xd3   :  { %579 = vmatpush.bf16.msra.mxu2 %v2304_v26  ;;  %v2966_v26 = vld [vmem:[#allocation12 + $0x38] sm:$0xff] }
  0xd4   :  { %v305_v31 = vmax.f32 %v304_v30, 0.0  ;;  %v2292_v30 = vor.u32 %v2934_v28, %v2291_v27  ;;  %v2965_v27 = vld [vmem:[#allocation12 + $0x30] sm:$0xff]  ;;  %v2964_v28 = vld [vmem:[#allocation12 + $0x28] sm:$0xff] }
  0xd6   :  { %v306_v32 = vpack.c.bf16 %v305_v31, %v305_v31  ;;  %v2293_v31 = vld [vmem:[#allocation7 + $0x38] sm:$0xf0]  ;;  %567 = vmatpush.bf16.msra.mxu1 %v2292_v30 }
  0xd7   :  { %v477_v30 = vld [vmem:[%s3813_s10] sm:$0x3] }
  0xd8   :  { %383 = vmatmul.bf16.vlgmr.msra.gmra.mxu0 %v306_v32  ;;  %v2296_v32 = vor.u32 %v2933_v29, %v2293_v31  ;;  %v2963_v29 = vld [vmem:[#allocation12 + $0x20] sm:$0xff]  ;;  %v2962_v31 = vld [vmem:[#allocation12 + $0x18] sm:$0xff] }
  0xda   :  { %580 = vmatpush.bf16.msra.mxu2 %v2296_v32  ;;  %v479_v32 = vperm.slane %v477_v30, 0 }
 0x155   :  { %v384_v34 = vpop.f32.mrf.mxu0 }
 0x156   :  { %v385_v35 = vadd.f32 %v3117_v33, %v384_v34  ;;  %v2283_v33 = vld [vmem:[#allocation7 + $0x20] sm:$0xf]  ;;  %v2932_v34 = vld [vmem:[#allocation7 + $0x24] sm:$0xf0] }
 0x158   :  { %390 = vadd.xlane.f32.xlu2 %v385_v35  ;;  %v400_v37 = vmul.f32 %v385_v35, %v385_v35 }
 0x15d   :  { %v386_v36 = vpop.f32.mrf.mxu0 }
 0x15e   :  { %v2284_v36 = vor.u32 %v2932_v34, %v2283_v33  ;;  %v2961_v34 = vld [vmem:[#allocation12 + $0x10] sm:$0xff] }
 0x160   :  { %401 = vadd.xlane.f32.xlu2 %v400_v37  ;;  %v2285_v37 = vld [vmem:[#allocation7 + $0x28] sm:$0xf0]  ;;  %568 = vmatpush.bf16.msra.mxu1 %v2284_v36 }
 0x164   :  { %569 = vmatpush.bf16.msra.mxu1 %v2276_v43 }
 0x1cb   :  { %v391_v44 = vpop.xlane.xlu2 %390 }
 0x1cc   :  { %v399_v46 = vmul.f32 %v3708_v45, %v391_v44  ;;  %v2280_v44 = vor.u32 %v2929_v41, %v2277_v42 }
 0x1ce   :  { %v404_v48 = vmul.f32 %v399_v46, %v399_v46  ;;  %v406_v58 = vsub.f32 %v385_v35, %v399_v46  ;;  %v2267_v46 = vld [vmem:[#allocation7] sm:$0xf] }
 0x1d3   :  { %v402_v47 = vpop.xlane.xlu2 %401 }
 0x1d4   :  { %v403_v49 = vmul.f32 %v402_v47, %v3708_v45  ;;  %v2928_v47 = vld [vmem:[#allocation7 + $0x4] sm:$0xf0] }
 0x1d6   :  { %v405_v50 = vsub.f32 %v403_v49, %v404_v48  ;;  %v2927_v48 = vld [vmem:[#allocation7 + $0x4] sm:$0xf]  ;;  %v2269_v49 = vld [vmem:[#allocation7 + $0x8] sm:$0xf0] }
 0x1d8   :  { %v407_v51 = vadd.f32 1e-05, %v405_v50  ;;  %v2268_v50 = vor.u32 %v2928_v47, %v2267_v46  ;;  %v2960_v46 = vld [vmem:[#allocation12 + $0x8] sm:$0xff]  ;;  %v2959_v47 = vld [vmem:[#allocation12] sm:$0xff] }
 0x1da   :  { %3142 = vrsqrt.f32 %v407_v51  ;;  %vm414_vm2 = vweird.f32 %v407_v51  ;;  %570 = vmatpush.bf16.msra.mxu1 %v2268_v50 }
 0x1de   :  { %820 = vmatpush.bf16.msrb.mxu1 %v2966_v26 }
 0x1e0   :  { %v3143_v52 = vpop.eup %3142 }
 0x1e1   :  { %v409_v53 = vmul.f32 %v3143_v52, %v407_v51  ;;  %vm415_vm1 = vweird.f32 %v3143_v52  ;;  %v2272_v51 = vor.u32 %v2927_v48, %v2269_v49  ;;  %v3122_v48 = vld [vmem:[#allocation10] ss:$0 sm:$0xff] }
 0x1e2   :  { %vm416_vm3 = vmor %vm414_vm2, %vm415_vm1  ;;  %821 = vmatpush.bf16.msrb.mxu1 %v2965_v27  ;;  %v3124_v27 = vld [vmem:[%s3850_s26 + $0x1] ss:$0 sm:$0xff] }
 0x1e3   :  { %v410_v54 = vmul.f32 %v3143_v52, %v409_v53 }
 0x1e5   :  { %v411_v55 = vmul.f32 0.5, %v410_v54 }
 0x1e6   :  { %822 = vmatpush.bf16.msrb.mxu1 %v2964_v28 }
 0x1e7   :  { %v412_v56 = vsub.f32 1.5, %v411_v55 }
 0x1e9   :  { %v413_v57 = vmul.f32 %v3143_v52, %v412_v56 }
 0x1ea   :  { %823 = vmatpush.bf16.msrb.mxu1 %v2963_v29 }
 0x1eb   :  { %v417_v60 = vsel %vm416_vm3, %v3143_v52, %v413_v57  ;;  %v2950_v57 = vld [vmem:[#allocation9 + $0x38] sm:$0xff] }
 0x1ec   :  { %v418_v61 = vmul.f32 %v417_v60, %v406_v58  ;;  %v2958_v58 = vld [vmem:[#allocation9 + $0x78] sm:$0xff]  ;;  %725 = vmatpush.bf16.msra.mxu3 %v2950_v57  ;;  %v2949_v60 = vld [vmem:[#allocation9 + $0x30] sm:$0xff] }
 0x1ed   :  { %738 = vmatpush.bf16.msrb.mxu0 %v2958_v58 }
 0x1ee   :  { %v422_v63 = vmul.f32 %v3118_v59, %v418_v61  ;;  %v2957_v61 = vld [vmem:[#allocation9 + $0x70] sm:$0xff]  ;;  %824 = vmatpush.bf16.msrb.mxu1 %v2962_v31 }
 0x1f0   :  { %v426_v0 = vadd.f32 %v3119_v62, %v422_v63  ;;  %726 = vmatpush.bf16.msra.mxu3 %v2949_v60  ;;  %v2948_v63 = vld [vmem:[#allocation9 + $0x28] sm:$0xff] }
 0x1f1   :  { %739 = vmatpush.bf16.msrb.mxu0 %v2957_v61 }
 0x1f2   :  { %v3718_v1 = vadd.f32 %v426_v0, %v385_v35  ;;  %v2931_v35 = vld [vmem:[#allocation7 + $0x24] sm:$0xf]  ;;  %v2956_v0 = vld [vmem:[#allocation9 + $0x68] sm:$0xff]  ;;  %825 = vmatpush.bf16.msrb.mxu1 %v2961_v34 }
 0x1f3   :  { %v2288_v40 = vor.u32 %v2931_v35, %v2285_v37  ;;  %v480_v37 = vperm.slane %v477_v30, 1  ;;  %v3125_v30 = vld [vmem:[%s3851_s2 + $0x1] ss:$0 sm:$0xff] }
 0x1f4   :  { %430 = vadd.xlane.f32.xlu1 %v3718_v1  ;;  %v433_v2 = vmul.f32 %v3718_v1, %v3718_v1  ;;  %727 = vmatpush.bf16.msra.mxu3 %v2948_v63 }
 0x1f5   :  { %581 = vmatpush.bf16.msra.mxu2 %v2288_v40  ;;  %740 = vmatpush.bf16.msrb.mxu0 %v2956_v0 }
 0x1f6   :  { %434 = vadd.xlane.f32.xlu2 %v433_v2  ;;  %v2947_v2 = vld [vmem:[#allocation9 + $0x20] sm:$0xff]  ;;  %826 = vmatpush.bf16.msrb.mxu1 %v2960_v46  ;;  %v2483_v46 = vld [vmem:[#allocation7 + $0xe8] sm:$0xf0] }
 0x1f8   :  { %728 = vmatpush.bf16.msra.mxu3 %v2947_v2 }
 0x1f9   :  { %582 = vmatpush.bf16.msra.mxu2 %v2280_v44  ;;  %741 = vmatpush.bf16.msrb.mxu0 %v2955_v3 }
 0x1fa   :  { %827 = vmatpush.bf16.msrb.mxu1 %v2959_v47 }
 0x1fc   :  { %729 = vmatpush.bf16.msra.mxu3 %v2946_v6 }
 0x1fd   :  { %583 = vmatpush.bf16.msra.mxu2 %v2272_v51  ;;  %742 = vmatpush.bf16.msrb.mxu0 %v2954_v7 }
 0x200   :  { %730 = vmatpush.bf16.msra.mxu3 %v2945_v10 }
 0x201   :  { %743 = vmatpush.bf16.msrb.mxu0 %v2953_v22 }
 0x204   :  { %731 = vmatpush.bf16.msra.mxu3 %v2944_v21 }
 0x205   :  { %744 = vmatpush.bf16.msrb.mxu0 %v2952_v24 }
 0x208   :  { %732 = vmatpush.bf16.msra.mxu3 %v2943_v23 }
 0x209   :  { %745 = vmatpush.bf16.msrb.mxu0 %v2951_v25 }
 0x267   :  { %v431_v52 = vpop.xlane.xlu1 %430 }
 0x268   :  { %v432_v53 = vmul.f32 %v431_v52, %v3708_v45 }
 0x269   :  { %v435_v54 = vpop.xlane.xlu2 %434 }
 0x26a   :  { %v437_v55 = vmul.f32 %v432_v53, %v432_v53  ;;  %v436_v56 = vmul.f32 %v435_v54, %v3708_v45  ;;  %v439_v13 = vsub.f32 %v3718_v1, %v432_v53 }
 0x26c   :  { %v438_v59 = vsub.f32 %v436_v56, %v437_v55  ;;  %v3123_v56 = vld [vmem:[#allocation13] ss:$0 sm:$0xff] }
 0x26e   :  { %v440_v62 = vadd.f32 1e-05, %v438_v59 }
 0x270   :  { %3144 = vrsqrt.f32 %v440_v62  ;;  %vm447_vm5 = vweird.f32 %v440_v62 }
 0x276   :  { %v3145_v4 = vpop.eup %3144 }
 0x277   :  { %v442_v5 = vmul.f32 %v3145_v4, %v440_v62  ;;  %vm448_vm4 = vweird.f32 %v3145_v4 }
 0x278   :  { %vm449_vm6 = vmor %vm447_vm5, %vm448_vm4 }
 0x279   :  { %v443_v8 = vmul.f32 %v3145_v4, %v442_v5 }
 0x27b   :  { %v444_v9 = vmul.f32 0.5, %v443_v8 }
 0x27d   :  { %v445_v11 = vsub.f32 1.5, %v444_v9 }
 0x27f   :  { %v446_v12 = vmul.f32 %v3145_v4, %v445_v11 }
 0x281   :  { %v450_v15 = vsel %vm449_vm6, %v3145_v4, %v446_v12 }
 0x282   :  { %v451_v16 = vmul.f32 %v450_v15, %v439_v13 }
 0x284   :  { %v455_v18 = vmul.f32 %v3120_v14, %v451_v16 }
 0x286   :  { %v459_v19 = vadd.f32 %v3121_v17, %v455_v18 }
 0x288   :  { %v460_v20 = vpack.c.bf16 %v459_v19, %v459_v19 }
 0x28a   :  { %571 = vmatmul.bf16.vlgmr.msra.gmra.mxu1 %v460_v20  ;;  %584 = vmatmul.bf16.vlgmr.msra.gmra.mxu2 %v460_v20 }
 0x307   :  { %v572_v33 = vpop.f32.mrf.mxu1 }
 0x308   :  { %v573_v35 = vadd.f32 %v572_v33, %v479_v32 }
 0x30a   :  { %v589_v36 = vmax.f32 %v573_v35, 0.0  ;;  %v2489_v35 = vld [vmem:[#allocation7 + $0xf0] sm:$0xf] }
 0x30c   :  { %v591_v38 = vpack.c.bf16 %v589_v36, %v589_v36  ;;  %v2982_v36 = vld [vmem:[#allocation7 + $0xf4] sm:$0xf0] }
 0x30d   :  { %v585_v39 = vpop.f32.mrf.mxu2 }
 0x30e   :  { %v586_v40 = vadd.f32 %v585_v39, %v480_v37  ;;  %733 = vmatmul.bf16.vlgmr.msra.gmra.mxu3 %v591_v38  ;;  %v2981_v37 = vld [vmem:[#allocation7 + $0xf4] sm:$0xf]  ;;  %v2490_v38 = vor.u32 %v2982_v36, %v2489_v35  ;;  %v2491_v39 = vld [vmem:[#allocation7 + $0xf8] sm:$0xf0]  ;;  %v2995_v35 = vld [vmem:[#allocation9 + $0xe0] sm:$0xff] }
 0x30f   :  { %v574_v41 = vpop.f32.mrf.mxu1 }
 0x310   :  { %v590_v42 = vmax.f32 %v586_v40, 0.0  ;;  %v2494_v40 = vor.u32 %v2981_v37, %v2491_v39  ;;  %1029 = vmatpush.bf16.msrb.mxu2 %v2490_v38  ;;  %v2481_v41 = vld [vmem:[#allocation7 + $0xe0] sm:$0xf]  ;;  %v2986_v38 = vld [vmem:[#allocation9 + $0x98] sm:$0xff] }
 0x311   :  { %v2994_v39 = vld [vmem:[#allocation9 + $0xd8] sm:$0xff] }
 0x312   :  { %v592_v43 = vpack.c.bf16 %v590_v42, %v590_v42  ;;  %1042 = vmatpush.bf16.msrb.mxu3 %v2494_v40  ;;  %v2980_v42 = vld [vmem:[#allocation7 + $0xe4] sm:$0xf0] }
 0x314   :  { %746 = vmatmul.bf16.vlgmr.msrb.gmra.mxu0 %v592_v43  ;;  %v2979_v43 = vld [vmem:[#allocation7 + $0xe4] sm:$0xf] }
 0x315   :  { %v587_v44 = vpop.f32.mrf.mxu2  ;;  %v2486_v47 = vor.u32 %v2979_v43, %v2483_v46  ;;  %v2993_v43 = vld [vmem:[#allocation9 + $0xd0] sm:$0xff] }
 0x316   :  { %v2482_v44 = vor.u32 %v2980_v42, %v2481_v41  ;;  %v2985_v42 = vld [vmem:[#allocation9 + $0x90] sm:$0xff] }
 0x317   :  { %1043 = vmatpush.bf16.msrb.mxu3 %v2486_v47 }
 0x318   :  { %1030 = vmatpush.bf16.msrb.mxu2 %v2482_v44 }
 0x391   :  { %v734_v49 = vpop.f32.mrf.mxu3  ;;  %v747_v50 = vpop.f32.mrf.mxu0 }
 0x392   :  { %v735_v51 = vadd.f32 %v3122_v48, %v734_v49  ;;  %v2473_v48 = vld [vmem:[#allocation7 + $0xd0] sm:$0xf]  ;;  %v2978_v49 = vld [vmem:[#allocation7 + $0xd4] sm:$0xf0] }
 0x394   :  { %v748_v52 = vadd.f32 %v747_v50, %v735_v51  ;;  %v2977_v50 = vld [vmem:[#allocation7 + $0xd4] sm:$0xf]  ;;  %v2474_v51 = vor.u32 %v2978_v49, %v2473_v48  ;;  %v3126_v48 = vld [vmem:[%s3852_s13 + $0x1] ss:$0 sm:$0xff] }
 0x396   :  { %v751_v53 = vpack.c.bf16 %v748_v52, %v748_v52  ;;  %v852_v8 = vsub.f32 %v748_v52, %v3718_v1  ;;  %v2475_v52 = vld [vmem:[#allocation7 + $0xd8] sm:$0xf0]  ;;  %1031 = vmatpush.bf16.msrb.mxu2 %v2474_v51 }
 0x397   :  { %v3127_v51 = vld [vmem:[%s3811_s8 + $0x1] ss:$0 sm:$0xff] }
 0x398   :  { %828 = vmatmul.bf16.vlgmr.msrb.gmra.mxu1 %v751_v53  ;;  %v2478_v53 = vor.u32 %v2977_v50, %v2475_v52 }
 0x399   :  { %v736_v54 = vpop.f32.mrf.mxu3  ;;  %v749_v55 = vpop.f32.mrf.mxu0 }
 0x39a   :  { %1044 = vmatpush.bf16.msrb.mxu3 %v2478_v53  ;;  %v2465_v54 = vld [vmem:[#allocation7 + $0xc0] sm:$0xf]  ;;  %v2976_v55 = vld [vmem:[#allocation7 + $0xc4] sm:$0xf0] }
 0x415   :  { %v829_v57 = vpop.f32.mrf.mxu1 }
 0x416   :  { %v830_v58 = vadd.f32 %v3123_v56, %v829_v57  ;;  %v2975_v56 = vld [vmem:[#allocation7 + $0xc4] sm:$0xf]  ;;  %v2466_v57 = vor.u32 %v2976_v55, %v2465_v54  ;;  %v2984_v55 = vld [vmem:[#allocation9 + $0x88] sm:$0xff] }
 0x418   :  { %v2425_v59 = vmul.f32 -1.442695, %v830_v58  ;;  %v2467_v58 = vld [vmem:[#allocation7 + $0xc8] sm:$0xf0]  ;;  %1032 = vmatpush.bf16.msrb.mxu2 %v2466_v57  ;;  %v2983_v57 = vld [vmem:[#allocation9 + $0x80] sm:$0xff] }
 0x41a   :  { %3146 = vpow2.f32 %v2425_v59  ;;  %v2470_v59 = vor.u32 %v2975_v56, %v2467_v58  ;;  %v2992_v56 = vld [vmem:[#allocation9 + $0xc8] sm:$0xff]  ;;  %v2991_v58 = vld [vmem:[#allocation9 + $0xc0] sm:$0xff] }
 0x41c   :  { %1045 = vmatpush.bf16.msrb.mxu3 %v2470_v59  ;;  %v3006_v59 = vld [vmem:[#allocation12 + $0x78] sm:$0xff] }
 0x41d   :  { %v831_v60 = vpop.f32.mrf.mxu1 }
 0x41e   :  { %v2457_v60 = vld [vmem:[#allocation7 + $0xb0] sm:$0xf] }
 0x420   :  { %v3147_v61 = vpop.eup %3146 }
 0x421   :  { %v836_v62 = vadd.f32 1.0, %v3147_v61  ;;  %v2974_v61 = vld [vmem:[#allocation7 + $0xb4] sm:$0xf0] }
 0x423   :  { %3148 = vrcp.f32 %v836_v62  ;;  %v848_v3 = vand.u32 2147483648, %v836_v62  ;;  %v846_v5 = vand.u32 2147483647, %v836_v62  ;;  %vm842_vm8 = vweird.f32 %v836_v62 }
 0x425   :  { %v849_v7 = vor.u32 1.1754944e-38, %v848_v3  ;;  %vm847_vm10 = vcmp.eq.f32.partialorder %v846_v5, 8.507059e+37  ;;  %v2449_v3 = vld [vmem:[#allocation7 + $0xa0] sm:$0xf]  ;;  %v2971_v5 = vld [vmem:[#allocation7 + $0xa4] sm:$0xf] }
 0x429   :  { %v3149_v63 = vpop.eup %3148 }
 0x42a   :  { %v838_v0 = vmul.f32 %v3149_v63, %v836_v62  ;;  %vm843_vm7 = vweird.f32 %v3149_v63  ;;  %v2973_v62 = vld [vmem:[#allocation7 + $0xb4] sm:$0xf] }
 0x42b   :  { %vm844_vm9 = vmor %vm842_vm8, %vm843_vm7 }
 0x42c   :  { %v839_v2 = vsub.f32 1.0, %v838_v0  ;;  %v2459_v0 = vld [vmem:[#allocation7 + $0xb8] sm:$0xf0] }
 0x42e   :  { %v840_v4 = vmul.f32 %v3149_v63, %v839_v2  ;;  %v2462_v2 = vor.u32 %v2973_v62, %v2459_v0  ;;  %v3003_v62 = vld [vmem:[#allocation12 + $0x60] sm:$0xff]  ;;  %v2430_v0 = vld [vmem:[%s3813_s10 + $0x2] sm:$0x3] }
 0x430   :  { %v841_v6 = vadd.f32 %v3149_v63, %v840_v4  ;;  %1046 = vmatpush.bf16.msrb.mxu3 %v2462_v2  ;;  %v2972_v4 = vld [vmem:[#allocation7 + $0xa4] sm:$0xf0]  ;;  %v3001_v2 = vld [vmem:[#allocation12 + $0x50] sm:$0xff] }
 0x432   :  { %v845_v9 = vsel %vm844_vm9, %v3149_v63, %v841_v6  ;;  %v2458_v63 = vor.u32 %v2974_v61, %v2457_v60  ;;  %v2450_v6 = vor.u32 %v2972_v4, %v2449_v3  ;;  %v3005_v60 = vld [vmem:[#allocation12 + $0x70] sm:$0xff]  ;;  %v3004_v61 = vld [vmem:[#allocation12 + $0x68] sm:$0xff]  ;;  %v945_v3 = vperm.slane %v2430_v0, 0 }
 0x433   :  { %v850_v10 = vsel %vm847_vm10, %v849_v7, %v845_v9  ;;  %v2451_v7 = vld [vmem:[#allocation7 + $0xa8] sm:$0xf0]  ;;  %v2441_v9 = vld [vmem:[#allocation7 + $0x90] sm:$0xf]  ;;  %v946_v4 = vperm.slane %v2430_v0, 1 }
 0x434   :  { %v853_v11 = vmul.f32 %v852_v8, %v850_v10  ;;  %1033 = vmatpush.bf16.msrb.mxu2 %v2458_v63  ;;  %v2454_v8 = vor.u32 %v2971_v5, %v2451_v7  ;;  %v2970_v10 = vld [vmem:[#allocation7 + $0x94] sm:$0xf0]  ;;  %v3002_v63 = vld [vmem:[#allocation12 + $0x58] sm:$0xff] }
 0x436   :  { %v854_v12 = vadd.f32 %v853_v11, %v3718_v1  ;;  %v2969_v11 = vld [vmem:[#allocation7 + $0x94] sm:$0xf]  ;;  %1047 = vmatpush.bf16.msrb.mxu3 %v2454_v8 }
 0x438   :  { %859 = vadd.xlane.f32.xlu0 %v854_v12  ;;  %v862_v13 = vmul.f32 %v854_v12, %v854_v12  ;;  %1034 = vmatpush.bf16.msrb.mxu2 %v2450_v6 }
 0x43a   :  { %863 = vadd.xlane.f32.xlu2 %v862_v13  ;;  %v2443_v13 = vld [vmem:[#allocation7 + $0x98] sm:$0xf0] }
 0x4ab   :  { %v860_v14 = vpop.xlane.xlu0 %859 }
 0x4ac   :  { %v861_v15 = vmul.f32 %v860_v14, %v3708_v45  ;;  %v2433_v14 = vld [vmem:[#allocation7 + $0x80] sm:$0xf] }
 0x4ad   :  { %v864_v16 = vpop.xlane.xlu2 %863 }
 0x4ae   :  { %v866_v17 = vmul.f32 %v861_v15, %v861_v15  ;;  %v865_v18 = vmul.f32 %v864_v16, %v3708_v45  ;;  %v868_v26 = vsub.f32 %v854_v12, %v861_v15  ;;  %v2968_v15 = vld [vmem:[#allocation7 + $0x84] sm:$0xf0] }
 0x4b0   :  { %v867_v19 = vsub.f32 %v865_v18, %v866_v17  ;;  %v2446_v17 = vor.u32 %v2969_v11, %v2443_v13  ;;  %v2967_v18 = vld [vmem:[#allocation7 + $0x84] sm:$0xf] }
 0x4b2   :  { %v869_v20 = vadd.f32 1e-05, %v867_v19  ;;  %v2435_v19 = vld [vmem:[#allocation7 + $0x88] sm:$0xf0]  ;;  %1048 = vmatpush.bf16.msrb.mxu3 %v2446_v17  ;;  %v3128_v17 = vld [vmem:[#allocation10 + $0x1] ss:$0 sm:$0xff] }
 0x4b4   :  { %3150 = vrsqrt.f32 %v869_v20  ;;  %vm876_vm12 = vweird.f32 %v869_v20 }
 0x4ba   :  { %v3151_v21 = vpop.eup %3150 }
 0x4bb   :  { %v871_v22 = vmul.f32 %v3151_v21, %v869_v20  ;;  %vm877_vm11 = vweird.f32 %v3151_v21  ;;  %v2434_v20 = vor.u32 %v2968_v15, %v2433_v14  ;;  %v3000_v15 = vld [vmem:[#allocation12 + $0x48] sm:$0xff] }
 0x4bc   :  { %vm878_vm13 = vmor %vm876_vm12, %vm877_vm11 }
 0x4bd   :  { %v872_v23 = vmul.f32 %v3151_v21, %v871_v22 }
 0x4bf   :  { %v873_v24 = vmul.f32 0.5, %v872_v23 }
 0x4c1   :  { %v874_v25 = vsub.f32 1.5, %v873_v24 }
 0x4c3   :  { %v875_v1 = vmul.f32 %v3151_v21, %v874_v25 }
 0x4c5   :  { %v879_v28 = vsel %vm878_vm13, %v3151_v21, %v875_v1  ;;  %v2438_v21 = vor.u32 %v2967_v18, %v2435_v19  ;;  %v2990_v1 = vld [vmem:[#allocation9 + $0xb8] sm:$0xff] }
 0x4c6   :  { %v880_v29 = vmul.f32 %v879_v28, %v868_v26  ;;  %v2998_v26 = vld [vmem:[#allocation9 + $0xf8] sm:$0xff]  ;;  %1193 = vmatpush.bf16.msra.mxu0 %v2990_v1  ;;  %v2989_v28 = vld [vmem:[#allocation9 + $0xb0] sm:$0xff] }
 0x4c7   :  { %1049 = vmatpush.bf16.msrb.mxu3 %v2438_v21  ;;  %1206 = vmatpush.bf16.msra.mxu1 %v2998_v26 }
 0x4c8   :  { %v884_v31 = vmul.f32 %v3124_v27, %v880_v29  ;;  %v2997_v29 = vld [vmem:[#allocation9 + $0xf0] sm:$0xff] }
 0x4ca   :  { %v888_v32 = vadd.f32 %v3125_v30, %v884_v31  ;;  %1194 = vmatpush.bf16.msra.mxu0 %v2989_v28  ;;  %v2988_v31 = vld [vmem:[#allocation9 + $0xa8] sm:$0xff] }
 0x4cb   :  { %1207 = vmatpush.bf16.msra.mxu1 %v2997_v29 }
 0x4cc   :  { %v3745_v33 = vadd.f32 %v888_v32, %v854_v12  ;;  %v2442_v12 = vor.u32 %v2970_v10, %v2441_v9  ;;  %v2996_v32 = vld [vmem:[#allocation9 + $0xe8] sm:$0xff] }
 0x4ce   :  { %894 = vadd.xlane.f32.xlu2 %v3745_v33  ;;  %v897_v34 = vmul.f32 %v3745_v33, %v3745_v33  ;;  %1035 = vmatpush.bf16.msrb.mxu2 %v2442_v12 }
 0x4cf   :  { %1195 = vmatpush.bf16.msra.mxu0 %v2988_v31  ;;  %1208 = vmatpush.bf16.msra.mxu1 %v2996_v32 }
 0x4d2   :  { %1036 = vmatpush.bf16.msrb.mxu2 %v2434_v20 }
 0x4d3   :  { %1209 = vmatpush.bf16.msra.mxu1 %v2995_v35 }
 0x4d6   :  { %898 = vadd.xlane.f32.xlu2 %v897_v34  ;;  %v2987_v34 = vld [vmem:[#allocation9 + $0xa0] sm:$0xff]  ;;  %1290 = vmatpush.bf16.msra.mxu2 %v3006_v59 }
 0x4d7   :  { %1196 = vmatpush.bf16.msra.mxu0 %v2987_v34  ;;  %1210 = vmatpush.bf16.msra.mxu1 %v2994_v39 }
 0x4da   :  { %1291 = vmatpush.bf16.msra.mxu2 %v3005_v60  ;;  %v3130_v60 = vld [vmem:[%s3850_s26 + $0x2] ss:$0 sm:$0xff] }
 0x4db   :  { %1197 = vmatpush.bf16.msra.mxu0 %v2986_v38  ;;  %1211 = vmatpush.bf16.msra.mxu1 %v2993_v43 }
 0x4de   :  { %1292 = vmatpush.bf16.msra.mxu2 %v3004_v61 }
 0x4df   :  { %1198 = vmatpush.bf16.msra.mxu0 %v2985_v42  ;;  %1212 = vmatpush.bf16.msra.mxu1 %v2992_v56 }
 0x4e2   :  { %1293 = vmatpush.bf16.msra.mxu2 %v3003_v62 }
 0x4e3   :  { %1199 = vmatpush.bf16.msra.mxu0 %v2984_v55  ;;  %1213 = vmatpush.bf16.msra.mxu1 %v2991_v58 }
 0x4e6   :  { %1294 = vmatpush.bf16.msra.mxu2 %v3002_v63  ;;  %v3131_v63 = vld [vmem:[%s3851_s2 + $0x2] ss:$0 sm:$0xff] }
 0x4e7   :  { %1200 = vmatpush.bf16.msra.mxu0 %v2983_v57 }
 0x4ea   :  { %1295 = vmatpush.bf16.msra.mxu2 %v3001_v2 }
 0x4ee   :  { %1296 = vmatpush.bf16.msra.mxu2 %v3000_v15  ;;  %v2649_v15 = vld [vmem:[#allocation7 + $0x168] sm:$0xf0] }
 0x541   :  { %v895_v16 = vpop.xlane.xlu2 %894 }
 0x542   :  { %v896_v22 = vmul.f32 %v895_v16, %v3708_v45  ;;  %v2999_v16 = vld [vmem:[#allocation12 + $0x40] sm:$0xff] }
 0x543   :  { %1297 = vmatpush.bf16.msra.mxu2 %v2999_v16 }
 0x544   :  { %v901_v24 = vmul.f32 %v896_v22, %v896_v22  ;;  %v903_v47 = vsub.f32 %v3745_v33, %v896_v22 }
 0x549   :  { %v899_v23 = vpop.xlane.xlu2 %898 }
 0x54a   :  { %v900_v25 = vmul.f32 %v899_v23, %v3708_v45 }
 0x54c   :  { %v902_v27 = vsub.f32 %v900_v25, %v901_v24  ;;  %v3129_v25 = vld [vmem:[#allocation13 + $0x1] ss:$0 sm:$0xff] }
 0x54e   :  { %v904_v30 = vadd.f32 1e-05, %v902_v27 }
 0x550   :  { %3152 = vrsqrt.f32 %v904_v30  ;;  %vm911_vm15 = vweird.f32 %v904_v30 }
 0x556   :  { %v3153_v36 = vpop.eup %3152 }
 0x557   :  { %v906_v37 = vmul.f32 %v3153_v36, %v904_v30  ;;  %vm912_vm14 = vweird.f32 %v3153_v36 }
 0x558   :  { %vm913_vm0 = vmor %vm911_vm15, %vm912_vm14 }
 0x559   :  { %v907_v40 = vmul.f32 %v3153_v36, %v906_v37 }
 0x55b   :  { %v908_v41 = vmul.f32 0.5, %v907_v40 }
 0x55d   :  { %v909_v44 = vsub.f32 1.5, %v908_v41 }
 0x55f   :  { %v910_v46 = vmul.f32 %v3153_v36, %v909_v44 }
 0x561   :  { %v914_v49 = vsel %vm913_vm0, %v3153_v36, %v910_v46 }
 0x562   :  { %v915_v50 = vmul.f32 %v914_v49, %v903_v47 }
 0x564   :  { %v919_v52 = vmul.f32 %v3126_v48, %v915_v50 }
 0x566   :  { %v923_v53 = vadd.f32 %v3127_v51, %v919_v52 }
 0x568   :  { %v924_v54 = vpack.c.bf16 %v923_v53, %v923_v53 }
 0x56a   :  { %1037 = vmatmul.bf16.vlgmr.msrb.gmra.mxu2 %v924_v54  ;;  %1050 = vmatmul.bf16.vlgmr.msrb.gmra.mxu3 %v924_v54 }
 0x5ed   :  { %v1038_v5 = vpop.f32.mrf.mxu2  ;;  %v1051_v6 = vpop.f32.mrf.mxu3 }
 0x5ee   :  { %v1039_v7 = vadd.f32 %v1038_v5, %v945_v3  ;;  %v1052_v8 = vadd.f32 %v1051_v6, %v946_v4  ;;  %v2655_v5 = vld [vmem:[#allocation7 + $0x170] sm:$0xf]  ;;  %v3022_v6 = vld [vmem:[#allocation7 + $0x174] sm:$0xf0] }
 0x5f0   :  { %v1055_v9 = vmax.f32 %v1039_v7, 0.0  ;;  %v1056_v10 = vmax.f32 %v1052_v8, 0.0  ;;  %v3021_v7 = vld [vmem:[#allocation7 + $0x174] sm:$0xf]  ;;  %v2656_v8 = vor.u32 %v3022_v6, %v2655_v5  ;;  %v3027_v5 = vld [vmem:[#allocation9 + $0x120] sm:$0xff] }
 0x5f2   :  { %v1057_v11 = vpack.c.bf16 %v1055_v9, %v1055_v9  ;;  %v1058_v12 = vpack.c.bf16 %v1056_v10, %v1056_v10  ;;  %v2657_v9 = vld [vmem:[#allocation7 + $0x178] sm:$0xf0]  ;;  %1499 = vmatpush.bf16.msra.mxu3 %v2656_v8 }
 0x5f3   :  { %v2660_v10 = vor.u32 %v3021_v7, %v2657_v9  ;;  %v3026_v8 = vld [vmem:[#allocation9 + $0x118] sm:$0xff] }
 0x5f4   :  { %1201 = vmatmul.bf16.vlgmr.msra.gmra.mxu0 %v1057_v11  ;;  %1214 = vmatmul.bf16.vlgmr.msra.gmra.mxu1 %v1058_v12  ;;  %v2647_v11 = vld [vmem:[#allocation7 + $0x160] sm:$0xf]  ;;  %v3020_v12 = vld [vmem:[#allocation7 + $0x164] sm:$0xf0] }
 0x5f5   :  { %v1040_v13 = vpop.f32.mrf.mxu2  ;;  %v1053_v14 = vpop.f32.mrf.mxu3  ;;  %1512 = vmatpush.bf16.msrb.mxu0 %v2660_v10 }
 0x5f6   :  { %v3019_v13 = vld [vmem:[#allocation7 + $0x164] sm:$0xf]  ;;  %v2648_v14 = vor.u32 %v3020_v12, %v2647_v11  ;;  %v3033_v11 = vld [vmem:[#allocation9 + $0x150] sm:$0xff] }
 0x5f7   :  { %v2652_v16 = vor.u32 %v3019_v13, %v2649_v15  ;;  %v3132_v15 = vld [vmem:[%s3852_s13 + $0x2] ss:$0 sm:$0xff] }
 0x5f8   :  { %1500 = vmatpush.bf16.msra.mxu3 %v2648_v14 }
 0x5f9   :  { %1513 = vmatpush.bf16.msrb.mxu0 %v2652_v16 }
 0x671   :  { %v1202_v18 = vpop.f32.mrf.mxu0  ;;  %v1215_v19 = vpop.f32.mrf.mxu1 }
 0x672   :  { %v1203_v20 = vadd.f32 %v3128_v17, %v1202_v18  ;;  %v2639_v17 = vld [vmem:[#allocation7 + $0x150] sm:$0xf]  ;;  %v3018_v18 = vld [vmem:[#allocation7 + $0x154] sm:$0xf0] }
 0x674   :  { %v1216_v21 = vadd.f32 %v1215_v19, %v1203_v20  ;;  %v3017_v19 = vld [vmem:[#allocation7 + $0x154] sm:$0xf]  ;;  %v2640_v20 = vor.u32 %v3018_v18, %v2639_v17  ;;  %v3133_v18 = vld [vmem:[%s3811_s8 + $0x2] ss:$0 sm:$0xff] }
 0x676   :  { %v1219_v22 = vpack.c.bf16 %v1216_v21, %v1216_v21  ;;  %v1322_v40 = vsub.f32 %v1216_v21, %v3745_v33  ;;  %v2641_v21 = vld [vmem:[#allocation7 + $0x158] sm:$0xf0]  ;;  %1501 = vmatpush.bf16.msra.mxu3 %v2640_v20 }
 0x678   :  { %1298 = vmatmul.bf16.vlgmr.msra.gmra.mxu2 %v1219_v22  ;;  %v2644_v22 = vor.u32 %v3017_v19, %v2641_v21 }
 0x679   :  { %v1204_v23 = vpop.f32.mrf.mxu0  ;;  %v1217_v24 = vpop.f32.mrf.mxu1 }
 0x67a   :  { %1514 = vmatpush.bf16.msrb.mxu0 %v2644_v22  ;;  %v2631_v23 = vld [vmem:[#allocation7 + $0x140] sm:$0xf]  ;;  %v3016_v24 = vld [vmem:[#allocation7 + $0x144] sm:$0xf0] }
 0x67b   :  { %v3032_v22 = vld [vmem:[#allocation9 + $0x148] sm:$0xff] }
 0x6fb   :  { %v1299_v1 = vpop.f32.mrf.mxu2 }
 0x6fc   :  { %v1300_v26 = vadd.f32 %v3129_v25, %v1299_v1  ;;  %v3015_v25 = vld [vmem:[#allocation7 + $0x144] sm:$0xf]  ;;  %v2632_v1 = vor.u32 %v3016_v24, %v2631_v23  ;;  %v3025_v23 = vld [vmem:[#allocation9 + $0x110] sm:$0xff] }
 0x6fd   :  { %v3031_v24 = vld [vmem:[#allocation9 + $0x140] sm:$0xff] }
 0x6fe   :  { %v2591_v27 = vmul.f32 -1.442695, %v1300_v26  ;;  %v2633_v26 = vld [vmem:[#allocation7 + $0x148] sm:$0xf0]  ;;  %1502 = vmatpush.bf16.msra.mxu3 %v2632_v1  ;;  %v3023_v1 = vld [vmem:[#allocation9 + $0x100] sm:$0xff] }
 0x700   :  { %3154 = vpow2.f32 %v2591_v27  ;;  %v2636_v27 = vor.u32 %v3015_v25, %v2633_v26  ;;  %v3024_v25 = vld [vmem:[#allocation9 + $0x108] sm:$0xff]  ;;  %v3046_v26 = vld [vmem:[#allocation12 + $0xb8] sm:$0xff] }
 0x702   :  { %1515 = vmatpush.bf16.msrb.mxu0 %v2636_v27  ;;  %v3045_v27 = vld [vmem:[#allocation12 + $0xb0] sm:$0xff] }
 0x703   :  { %v1301_v28 = vpop.f32.mrf.mxu2 }
 0x704   :  { %v2623_v28 = vld [vmem:[#allocation7 + $0x130] sm:$0xf] }
 0x706   :  { %v3155_v29 = vpop.eup %3154 }
 0x707   :  { %v1306_v30 = vadd.f32 1.0, %v3155_v29  ;;  %v3014_v29 = vld [vmem:[#allocation7 + $0x134] sm:$0xf0] }
 0x709   :  { %3156 = vrcp.f32 %v1306_v30  ;;  %v1318_v35 = vand.u32 2147483648, %v1306_v30  ;;  %v1316_v37 = vand.u32 2147483647, %v1306_v30  ;;  %vm1312_vm2 = vweird.f32 %v1306_v30 }
 0x70b   :  { %v1319_v39 = vor.u32 1.1754944e-38, %v1318_v35  ;;  %vm1317_vm4 = vcmp.eq.f32.partialorder %v1316_v37, 8.507059e+37  ;;  %v2615_v35 = vld [vmem:[#allocation7 + $0x120] sm:$0xf]  ;;  %v3011_v37 = vld [vmem:[#allocation7 + $0x124] sm:$0xf] }
 0x70f   :  { %v3157_v31 = vpop.eup %3156 }
 0x710   :  { %v1308_v32 = vmul.f32 %v3157_v31, %v1306_v30  ;;  %vm1313_vm1 = vweird.f32 %v3157_v31  ;;  %v3013_v30 = vld [vmem:[#allocation7 + $0x134] sm:$0xf] }
 0x711   :  { %vm1314_vm3 = vmor %vm1312_vm2, %vm1313_vm1 }
 0x712   :  { %v1309_v34 = vsub.f32 1.0, %v1308_v32  ;;  %v2625_v32 = vld [vmem:[#allocation7 + $0x138] sm:$0xf0] }
 0x714   :  { %v1310_v36 = vmul.f32 %v3157_v31, %v1309_v34  ;;  %v2628_v34 = vor.u32 %v3013_v30, %v2625_v32  ;;  %v2596_v30 = vld [vmem:[%s3813_s10 + $0x4] sm:$0x3] }
 0x715   :  { %v1416_v32 = vperm.slane %v2596_v30, 1 }
 0x716   :  { %v1311_v38 = vadd.f32 %v3157_v31, %v1310_v36  ;;  %1516 = vmatpush.bf16.msrb.mxu0 %v2628_v34  ;;  %v3012_v36 = vld [vmem:[#allocation7 + $0x124] sm:$0xf0] }
 0x718   :  { %v1315_v41 = vsel %vm1314_vm3, %v3157_v31, %v1311_v38  ;;  %v2624_v31 = vor.u32 %v3014_v29, %v2623_v28  ;;  %v2616_v38 = vor.u32 %v3012_v36, %v2615_v35  ;;  %v3044_v28 = vld [vmem:[#allocation12 + $0xa8] sm:$0xff]  ;;  %v3043_v29 = vld [vmem:[#allocation12 + $0xa0] sm:$0xff]  ;;  %v3041_v35 = vld [vmem:[#allocation12 + $0x90] sm:$0xff] }
 0x719   :  { %v1320_v42 = vsel %vm1317_vm4, %v1319_v39, %v1315_v41  ;;  %v2617_v39 = vld [vmem:[#allocation7 + $0x128] sm:$0xf0]  ;;  %v2607_v41 = vld [vmem:[#allocation7 + $0x110] sm:$0xf] }
 0x71a   :  { %v1323_v43 = vmul.f32 %v1322_v40, %v1320_v42  ;;  %1503 = vmatpush.bf16.msra.mxu3 %v2624_v31  ;;  %v2620_v40 = vor.u32 %v3011_v37, %v2617_v39  ;;  %v3010_v42 = vld [vmem:[#allocation7 + $0x114] sm:$0xf0]  ;;  %v3042_v31 = vld [vmem:[#allocation12 + $0x98] sm:$0xff] }
 0x71c   :  { %v1324_v44 = vadd.f32 %v1323_v43, %v3745_v33  ;;  %1517 = vmatpush.bf16.msrb.mxu0 %v2620_v40  ;;  %v3009_v43 = vld [vmem:[#allocation7 + $0x114] sm:$0xf] }
 0x71e   :  { %1329 = vadd.xlane.f32.xlu2 %v1324_v44  ;;  %v1332_v46 = vmul.f32 %v1324_v44, %v1324_v44  ;;  %1504 = vmatpush.bf16.msra.mxu3 %v2616_v38  ;;  %v1415_v38 = vperm.slane %v2596_v30, 0  ;;  %v3061_v30 = vld [vmem:[#allocation16 + $0x30] sm:$0xff] }
 0x726   :  { %1333 = vadd.xlane.f32.xlu2 %v1332_v46  ;;  %v2609_v46 = vld [vmem:[#allocation7 + $0x118] sm:$0xf0] }
 0x791   :  { %v1330_v47 = vpop.xlane.xlu2 %1329 }
 0x792   :  { %v1331_v48 = vmul.f32 %v1330_v47, %v3708_v45  ;;  %v2612_v47 = vor.u32 %v3009_v43, %v2609_v46 }
 0x794   :  { %v1336_v50 = vmul.f32 %v1331_v48, %v1331_v48  ;;  %v1338_v59 = vsub.f32 %v1324_v44, %v1331_v48  ;;  %v2599_v48 = vld [vmem:[#allocation7 + $0x100] sm:$0xf]  ;;  %1518 = vmatpush.bf16.msrb.mxu0 %v2612_v47  ;;  %v3040_v47 = vld [vmem:[#allocation12 + $0x88] sm:$0xff] }
 0x799   :  { %v1334_v49 = vpop.xlane.xlu2 %1333 }
 0x79a   :  { %v1335_v51 = vmul.f32 %v1334_v49, %v3708_v45  ;;  %v3008_v49 = vld [vmem:[#allocation7 + $0x104] sm:$0xf0] }
 0x79c   :  { %v1337_v52 = vsub.f32 %v1335_v51, %v1336_v50  ;;  %v3007_v50 = vld [vmem:[#allocation7 + $0x104] sm:$0xf]  ;;  %v2600_v51 = vor.u32 %v3008_v49, %v2599_v48  ;;  %v3134_v49 = vld [vmem:[#allocation10 + $0x2] ss:$0 sm:$0xff] }
 0x79d   :  { %v3039_v48 = vld [vmem:[#allocation12 + $0x80] sm:$0xff] }
 0x79e   :  { %v1339_v53 = vadd.f32 1e-05, %v1337_v52  ;;  %v2601_v52 = vld [vmem:[#allocation7 + $0x108] sm:$0xf0] }
 0x7a0   :  { %3158 = vrsqrt.f32 %v1339_v53  ;;  %vm1346_vm6 = vweird.f32 %v1339_v53 }
 0x7a6   :  { %v3159_v54 = vpop.eup %3158 }
 0x7a7   :  { %v1341_v55 = vmul.f32 %v3159_v54, %v1339_v53  ;;  %vm1347_vm5 = vweird.f32 %v3159_v54  ;;  %v2604_v53 = vor.u32 %v3007_v50, %v2601_v52 }
 0x7a8   :  { %vm1348_vm7 = vmor %vm1346_vm6, %vm1347_vm5 }
 0x7a9   :  { %v1342_v56 = vmul.f32 %v3159_v54, %v1341_v55  ;;  %1519 = vmatpush.bf16.msrb.mxu0 %v2604_v53 }
 0x7ab   :  { %v1343_v57 = vmul.f32 0.5, %v1342_v56 }
 0x7ad   :  { %v1344_v58 = vsub.f32 1.5, %v1343_v57 }
 0x7af   :  { %v1345_v33 = vmul.f32 %v3159_v54, %v1344_v58 }
 0x7b1   :  { %v1349_v61 = vsel %vm1348_vm7, %v3159_v54, %v1345_v33  ;;  %v3038_v33 = vld [vmem:[#allocation9 + $0x178] sm:$0xff] }
 0x7b2   :  { %v1350_v62 = vmul.f32 %v1349_v61, %v1338_v59  ;;  %v3030_v59 = vld [vmem:[#allocation9 + $0x138] sm:$0xff]  ;;  %1676 = vmatpush.bf16.msrb.mxu2 %v3038_v33  ;;  %v3037_v61 = vld [vmem:[#allocation9 + $0x170] sm:$0xff] }
 0x7b3   :  { %1663 = vmatpush.bf16.msrb.mxu1 %v3030_v59  ;;  %v3053_v33 = vld [vmem:[#allocation15 + $0x30] sm:$0xff] }
 0x7b4   :  { %v1354_v0 = vmul.f32 %v3130_v60, %v1350_v62  ;;  %v3029_v62 = vld [vmem:[#allocation9 + $0x130] sm:$0xff]  ;;  %v3069_v59 = vld [vmem:[#allocation18 + $0x30] sm:$0xff] }
 0x7b6   :  { %v1358_v2 = vadd.f32 %v3131_v63, %v1354_v0  ;;  %1677 = vmatpush.bf16.msrb.mxu2 %v3037_v61  ;;  %v3036_v0 = vld [vmem:[#allocation9 + $0x168] sm:$0xff]  ;;  %v3068_v61 = vld [vmem:[#allocation18 + $0x28] sm:$0xff] }
 0x7b7   :  { %1664 = vmatpush.bf16.msrb.mxu1 %v3029_v62  ;;  %v3051_v62 = vld [vmem:[#allocation15 + $0x20] sm:$0xff] }
 0x7b8   :  { %v3772_v3 = vadd.f32 %v1358_v2, %v1324_v44  ;;  %v2608_v44 = vor.u32 %v3010_v42, %v2607_v41  ;;  %v3028_v2 = vld [vmem:[#allocation9 + $0x128] sm:$0xff] }
 0x7ba   :  { %1364 = vadd.xlane.f32.xlu1 %v3772_v3  ;;  %v1367_v4 = vmul.f32 %v3772_v3, %v3772_v3  ;;  %1505 = vmatpush.bf16.msra.mxu3 %v2608_v44 }
 0x7bb   :  { %1678 = vmatpush.bf16.msrb.mxu2 %v3036_v0  ;;  %1665 = vmatpush.bf16.msrb.mxu1 %v3028_v2  ;;  %v3050_v0 = vld [vmem:[#allocation15 + $0x18] sm:$0xff] }
 0x7bc   :  { %1368 = vadd.xlane.f32.xlu2 %v1367_v4  ;;  %v3035_v4 = vld [vmem:[#allocation9 + $0x160] sm:$0xff] }
 0x7bd   :  { %v3066_v2 = vld [vmem:[#allocation18 + $0x18] sm:$0xff] }
 0x7be   :  { %1506 = vmatpush.bf16.msra.mxu3 %v2600_v51 }
 0x7bf   :  { %1679 = vmatpush.bf16.msrb.mxu2 %v3035_v4  ;;  %1666 = vmatpush.bf16.msrb.mxu1 %v3027_v5  ;;  %v3049_v4 = vld [vmem:[#allocation15 + $0x10] sm:$0xff] }
 0x7c0   :  { %v3065_v5 = vld [vmem:[#allocation18 + $0x10] sm:$0xff] }
 0x7c2   :  { %1760 = vmatpush.bf16.msrb.mxu3 %v3046_v26 }
 0x7c3   :  { %1667 = vmatpush.bf16.msrb.mxu1 %v3026_v8  ;;  %v3047_v8 = vld [vmem:[#allocation15] sm:$0xff] }
 0x7c6   :  { %1761 = vmatpush.bf16.msrb.mxu3 %v3045_v27 }
 0x7c7   :  { %1668 = vmatpush.bf16.msrb.mxu1 %v3025_v23 }
 0x7ca   :  { %1762 = vmatpush.bf16.msrb.mxu3 %v3044_v28 }
 0x7cb   :  { %1669 = vmatpush.bf16.msrb.mxu1 %v3024_v25 }
 0x7ce   :  { %1763 = vmatpush.bf16.msrb.mxu3 %v3043_v29  ;;  %v3062_v29 = vld [vmem:[#allocation16 + $0x38] sm:$0xff] }
 0x7cf   :  { %1670 = vmatpush.bf16.msrb.mxu1 %v3023_v1 }
 0x7d2   :  { %1764 = vmatpush.bf16.msrb.mxu3 %v3042_v31  ;;  %v3060_v31 = vld [vmem:[#allocation16 + $0x28] sm:$0xff] }
 0x7d3   :  { %1965 = vmatpush.bf16.msra.mxu1 %v3062_v29 }
 0x7d6   :  { %1765 = vmatpush.bf16.msrb.mxu3 %v3041_v35  ;;  %v3057_v35 = vld [vmem:[#allocation16 + $0x10] sm:$0xff] }
 0x7d7   :  { %1966 = vmatpush.bf16.msra.mxu1 %v3061_v30 }
 0x7da   :  { %1766 = vmatpush.bf16.msrb.mxu3 %v3040_v47 }
 0x7db   :  { %1967 = vmatpush.bf16.msra.mxu1 %v3060_v31 }
 0x7de   :  { %1767 = vmatpush.bf16.msrb.mxu3 %v3039_v48  ;;  %v3075_v48 = vld [vmem:[#allocation18 + $0x60] sm:$0xff] }
 0x82d   :  { %v1365_v54 = vpop.xlane.xlu1 %1364 }
 0x82e   :  { %v1366_v55 = vmul.f32 %v1365_v54, %v3708_v45 }
 0x82f   :  { %v1369_v56 = vpop.xlane.xlu2 %1368 }
 0x830   :  { %v1371_v57 = vmul.f32 %v1366_v55, %v1366_v55  ;;  %v1370_v58 = vmul.f32 %v1369_v56, %v3708_v45  ;;  %v3034_v45 = vld [vmem:[#allocation9 + $0x158] sm:$0xff]  ;;  %v1373_v14 = vsub.f32 %v3772_v3, %v1366_v55 }
 0x831   :  { %1680 = vmatpush.bf16.msrb.mxu2 %v3034_v45  ;;  %v3135_v45 = vld [vmem:[#allocation13 + $0x2] ss:$0 sm:$0xff] }
 0x832   :  { %v1372_v60 = vsub.f32 %v1370_v58, %v1371_v57  ;;  %v3054_v57 = vld [vmem:[#allocation15 + $0x38] sm:$0xff] }
 0x833   :  { %v3070_v58 = vld [vmem:[#allocation18 + $0x38] sm:$0xff]  ;;  %1864 = vmatpush.bf16.msra.mxu0 %v3054_v57 }
 0x834   :  { %v1374_v63 = vadd.f32 1e-05, %v1372_v60  ;;  %v3052_v60 = vld [vmem:[#allocation15 + $0x28] sm:$0xff] }
 0x835   :  { %1681 = vmatpush.bf16.msrb.mxu2 %v3033_v11 }
 0x836   :  { %3160 = vrsqrt.f32 %v1374_v63  ;;  %vm1381_vm9 = vweird.f32 %v1374_v63 }
 0x837   :  { %1865 = vmatpush.bf16.msra.mxu0 %v3053_v33 }
 0x839   :  { %1682 = vmatpush.bf16.msrb.mxu2 %v3032_v22 }
 0x83b   :  { %1866 = vmatpush.bf16.msra.mxu0 %v3052_v60 }
 0x83c   :  { %v3161_v6 = vpop.eup %3160 }
 0x83d   :  { %v1376_v7 = vmul.f32 %v3161_v6, %v1374_v63  ;;  %vm1382_vm8 = vweird.f32 %v3161_v6  ;;  %1683 = vmatpush.bf16.msrb.mxu2 %v3031_v24  ;;  %v3067_v63 = vld [vmem:[#allocation18 + $0x20] sm:$0xff] }
 0x83e   :  { %vm1383_vm10 = vmor %vm1381_vm9, %vm1382_vm8 }
 0x83f   :  { %v1377_v9 = vmul.f32 %v3161_v6, %v1376_v7  ;;  %1867 = vmatpush.bf16.msra.mxu0 %v3051_v62  ;;  %v3064_v7 = vld [vmem:[#allocation18 + $0x8] sm:$0xff]  ;;  %v3073_v62 = vld [vmem:[#allocation18 + $0x50] sm:$0xff] }
 0x841   :  { %v1378_v10 = vmul.f32 0.5, %v1377_v9  ;;  %2112 = vmatpush.bf16.msra.mxu2 %v3070_v58  ;;  %v3063_v9 = vld [vmem:[#allocation18] sm:$0xff] }
 0x843   :  { %v1379_v12 = vsub.f32 1.5, %v1378_v10  ;;  %1868 = vmatpush.bf16.msra.mxu0 %v3050_v0  ;;  %v3071_v0 = vld [vmem:[#allocation18 + $0x40] sm:$0xff] }
 0x845   :  { %v1380_v13 = vmul.f32 %v3161_v6, %v1379_v12  ;;  %2113 = vmatpush.bf16.msra.mxu2 %v3069_v59 }
 0x847   :  { %v1384_v16 = vsel %vm1383_vm10, %v3161_v6, %v1380_v13  ;;  %1869 = vmatpush.bf16.msra.mxu0 %v3049_v4  ;;  %v3048_v6 = vld [vmem:[#allocation15 + $0x8] sm:$0xff]  ;;  %v3085_v4 = vld [vmem:[#allocation19 + $0x30] sm:$0xff] }
 0x848   :  { %v1385_v17 = vmul.f32 %v1384_v16, %v1373_v14 }
 0x849   :  { %2114 = vmatpush.bf16.msra.mxu2 %v3068_v61 }
 0x84a   :  { %v1389_v19 = vmul.f32 %v3132_v15, %v1385_v17 }
 0x84b   :  { %1870 = vmatpush.bf16.msra.mxu0 %v3048_v6  ;;  %v3083_v6 = vld [vmem:[#allocation19 + $0x20] sm:$0xff] }
 0x84c   :  { %v1393_v20 = vadd.f32 %v3133_v18, %v1389_v19 }
 0x84d   :  { %2115 = vmatpush.bf16.msra.mxu2 %v3067_v63  ;;  %v3072_v63 = vld [vmem:[#allocation18 + $0x48] sm:$0xff] }
 0x84e   :  { %v1394_v21 = vpack.c.bf16 %v1393_v20, %v1393_v20 }
 0x84f   :  { %1871 = vmatpush.bf16.msra.mxu0 %v3047_v8  ;;  %v3081_v8 = vld [vmem:[#allocation19 + $0x10] sm:$0xff] }
 0x850   :  { %1507 = vmatmul.bf16.vlgmr.msra.gmra.mxu3 %v1394_v21  ;;  %1520 = vmatmul.bf16.vlgmr.msrb.gmra.mxu0 %v1394_v21 }
 0x851   :  { %2116 = vmatpush.bf16.msra.mxu2 %v3066_v2  ;;  %v3086_v2 = vld [vmem:[#allocation19 + $0x38] sm:$0xff] }
 0x853   :  { %2208 = vmatpush.bf16.msrb.mxu0 %v3086_v2 }
 0x855   :  { %2117 = vmatpush.bf16.msra.mxu2 %v3065_v5  ;;  %v3084_v5 = vld [vmem:[#allocation19 + $0x28] sm:$0xff] }
 0x857   :  { %2209 = vmatpush.bf16.msrb.mxu0 %v3085_v4 }
 0x859   :  { %2118 = vmatpush.bf16.msra.mxu2 %v3064_v7  ;;  %v3082_v7 = vld [vmem:[#allocation19 + $0x18] sm:$0xff] }
 0x85b   :  { %2210 = vmatpush.bf16.msrb.mxu0 %v3084_v5 }
 0x85d   :  { %2119 = vmatpush.bf16.msra.mxu2 %v3063_v9 }
 0x85f   :  { %2211 = vmatpush.bf16.msrb.mxu0 %v3083_v6 }
 0x863   :  { %2212 = vmatpush.bf16.msrb.mxu0 %v3082_v7 }
 0x867   :  { %2213 = vmatpush.bf16.msrb.mxu0 %v3081_v8 }
 0x8cd   :  { %v1521_v34 = vpop.f32.mrf.mxu0 }
 0x8ce   :  { %v1522_v36 = vadd.f32 %v1521_v34, %v1416_v32  ;;  %v3059_v32 = vld [vmem:[#allocation16 + $0x20] sm:$0xff]  ;;  %v3058_v34 = vld [vmem:[#allocation16 + $0x18] sm:$0xff] }
 0x8cf   :  { %1968 = vmatpush.bf16.msra.mxu1 %v3059_v32 }
 0x8d0   :  { %v1526_v37 = vmax.f32 %v1522_v36, 0.0  ;;  %v3056_v36 = vld [vmem:[#allocation16 + $0x8] sm:$0xff] }
 0x8d2   :  { %v1528_v39 = vpack.c.bf16 %v1526_v37, %v1526_v37  ;;  %v3055_v37 = vld [vmem:[#allocation16] sm:$0xff] }
 0x8d3   :  { %v1508_v40 = vpop.f32.mrf.mxu3  ;;  %1969 = vmatpush.bf16.msra.mxu1 %v3058_v34 }
 0x8d4   :  { %v1509_v41 = vadd.f32 %v1508_v40, %v1415_v38  ;;  %1684 = vmatmul.bf16.vlgmr.msrb.gmra.mxu2 %v1528_v39  ;;  %v3078_v40 = vld [vmem:[#allocation18 + $0x78] sm:$0xff] }
 0x8d5   :  { %v1523_v42 = vpop.f32.mrf.mxu0  ;;  %2125 = vmatpush.bf16.msra.mxu3 %v3078_v40 }
 0x8d6   :  { %v1525_v43 = vmax.f32 %v1509_v41, 0.0  ;;  %v3077_v42 = vld [vmem:[#allocation18 + $0x70] sm:$0xff] }
 0x8d7   :  { %1970 = vmatpush.bf16.msra.mxu1 %v3057_v35 }
 0x8d8   :  { %v1527_v44 = vpack.c.bf16 %v1525_v43, %v1525_v43 }
 0x8d9   :  { %2126 = vmatpush.bf16.msra.mxu3 %v3077_v42 }
 0x8da   :  { %1671 = vmatmul.bf16.vlgmr.msrb.gmra.mxu1 %v1527_v44  ;;  %v3076_v44 = vld [vmem:[#allocation18 + $0x68] sm:$0xff] }
 0x8db   :  { %v1510_v46 = vpop.f32.mrf.mxu3  ;;  %1971 = vmatpush.bf16.msra.mxu1 %v3056_v36 }
 0x8dd   :  { %2127 = vmatpush.bf16.msra.mxu3 %v3076_v44 }
 0x8df   :  { %1972 = vmatpush.bf16.msra.mxu1 %v3055_v37 }
 0x8e1   :  { %2128 = vmatpush.bf16.msra.mxu3 %v3075_v48 }
 0x957   :  { %v1672_v50 = vpop.f32.mrf.mxu1  ;;  %v1685_v51 = vpop.f32.mrf.mxu2 }
 0x958   :  { %v1673_v52 = vadd.f32 %v3134_v49, %v1672_v50 }
 0x95a   :  { %v1686_v53 = vadd.f32 %v1685_v51, %v1673_v52  ;;  %v3074_v51 = vld [vmem:[#allocation18 + $0x58] sm:$0xff] }
 0x95b   :  { %2129 = vmatpush.bf16.msra.mxu3 %v3074_v51 }
 0x95c   :  { %v1689_v54 = vpack.c.bf16 %v1686_v53, %v1686_v53  ;;  %v1792_v24 = vsub.f32 %v1686_v53, %v3772_v3 }
 0x95e   :  { %1768 = vmatmul.bf16.vlgmr.msrb.gmra.mxu3 %v1689_v54 }
 0x95f   :  { %v1674_v55 = vpop.f32.mrf.mxu1  ;;  %v1687_v56 = vpop.f32.mrf.mxu2  ;;  %2130 = vmatpush.bf16.msra.mxu3 %v3073_v62 }
 0x963   :  { %2131 = vmatpush.bf16.msra.mxu3 %v3072_v63 }
 0x967   :  { %2132 = vmatpush.bf16.msra.mxu3 %v3071_v0 }
 0x9e1   :  { %v1769_v10 = vpop.f32.mrf.mxu3 }
 0x9e2   :  { %v1770_v11 = vadd.f32 %v3135_v45, %v1769_v10  ;;  %v3138_v45 = vld [vmem:[%s3821_s18] ss:$0 sm:$0xff] }
 0x9e4   :  { %v2757_v12 = vmul.f32 -1.442695, %v1770_v11 }
 0x9e6   :  { %3162 = vpow2.f32 %v2757_v12 }
 0x9e9   :  { %v1771_v13 = vpop.f32.mrf.mxu3 }
 0x9ec   :  { %v3163_v14 = vpop.eup %3162 }
 0x9ed   :  { %v1776_v15 = vadd.f32 1.0, %v3163_v14  ;;  %v3080_v14 = vld [vmem:[#allocation19 + $0x8] sm:$0xff] }
 0x9ee   :  { %2214 = vmatpush.bf16.msrb.mxu0 %v3080_v14 }
 0x9ef   :  { %3164 = vrcp.f32 %v1776_v15  ;;  %v1788_v19 = vand.u32 2147483648, %v1776_v15  ;;  %v1786_v21 = vand.u32 2147483647, %v1776_v15  ;;  %vm1782_vm12 = vweird.f32 %v1776_v15 }
 0x9f1   :  { %v1789_v23 = vor.u32 1.1754944e-38, %v1788_v19  ;;  %vm1787_vm14 = vcmp.eq.f32.partialorder %v1786_v21, 8.507059e+37 }
 0x9f5   :  { %v3165_v16 = vpop.eup %3164 }
 0x9f6   :  { %v1778_v17 = vmul.f32 %v3165_v16, %v1776_v15  ;;  %vm1783_vm11 = vweird.f32 %v3165_v16  ;;  %v3079_v15 = vld [vmem:[#allocation19] sm:$0xff] }
 0x9f7   :  { %vm1784_vm13 = vmor %vm1782_vm12, %vm1783_vm11  ;;  %2215 = vmatpush.bf16.msrb.mxu0 %v3079_v15 }
 0x9f8   :  { %v1779_v18 = vsub.f32 1.0, %v1778_v17 }
 0x9fa   :  { %v1780_v20 = vmul.f32 %v3165_v16, %v1779_v18 }
 0x9fc   :  { %v1781_v22 = vadd.f32 %v3165_v16, %v1780_v20 }
 0x9fe   :  { %v1785_v25 = vsel %vm1784_vm13, %v3165_v16, %v1781_v22  ;;  %v3137_v16 = vld [vmem:[%s3823_s20] ss:$0 sm:$0xff] }
 0x9ff   :  { %v1790_v1 = vsel %vm1787_vm14, %v1789_v23, %v1785_v25  ;;  %v3139_v23 = vld [vmem:[#allocation21] ss:$0 sm:$0xff] }
 0xa00   :  { %v1793_v26 = vmul.f32 %v1792_v24, %v1790_v1 }
 0xa02   :  { %v1794_v27 = vadd.f32 %v1793_v26, %v3772_v3  ;;  %v3136_v3 = vld [vmem:[%s3819_s16] ss:$0 sm:$0xff] }
 0xa04   :  { %v1795_v28 = vpack.c.bf16 %v1794_v27, %v1794_v27 }
 0xa06   :  { %1872 = vmatmul.bf16.vlgmr.msra.gmra.mxu0 %v1795_v28  ;;  %2120 = vmatmul.bf16.vlgmr.msra.gmra.mxu2 %v1795_v28 }
 0xa83   :  { %v1873_v38 = vpop.f32.mrf.mxu0 }
 0xa84   :  { %v1874_v39 = vadd.f32 %v3136_v3, %v1873_v38 }
 0xa86   :  { %v2790_v41 = vmul.f32 -1.442695, %v1874_v39 }
 0xa88   :  { %3166 = vpow2.f32 %v2790_v41 }
 0xa89   :  { %v2121_v43 = vpop.f32.mrf.mxu2 }
 0xa8a   :  { %v2122_v17 = vadd.f32 %v3137_v16, %v2121_v43 }
 0xa8b   :  { %v1875_v46 = vpop.f32.mrf.mxu0 }
 0xa8e   :  { %v3167_v47 = vpop.eup %3166 }
 0xa8f   :  { %v1880_v49 = vadd.f32 1.0, %v3167_v47 }
 0xa91   :  { %3168 = vrcp.f32 %v1880_v49  ;;  %v2123_v50 = vpop.f32.mrf.mxu2  ;;  %v1892_v55 = vand.u32 2147483648, %v1880_v49  ;;  %v1890_v57 = vand.u32 2147483647, %v1880_v49  ;;  %vm1886_vm0 = vweird.f32 %v1880_v49 }
 0xa93   :  { %v1893_v33 = vor.u32 1.1754944e-38, %v1892_v55  ;;  %vm1891_vm2 = vcmp.eq.f32.partialorder %v1890_v57, 8.507059e+37 }
 0xa97   :  { %v3169_v52 = vpop.eup %3168 }
 0xa98   :  { %v1882_v53 = vmul.f32 %v3169_v52, %v1880_v49  ;;  %vm1887_vm15 = vweird.f32 %v3169_v52 }
 0xa99   :  { %vm1888_vm1 = vmor %vm1886_vm0, %vm1887_vm15 }
 0xa9a   :  { %v1883_v54 = vsub.f32 1.0, %v1882_v53 }
 0xa9c   :  { %v1884_v56 = vmul.f32 %v3169_v52, %v1883_v54 }
 0xa9e   :  { %v1885_v58 = vadd.f32 %v3169_v52, %v1884_v56 }
 0xaa0   :  { %v1889_v59 = vsel %vm1888_vm1, %v3169_v52, %v1885_v58 }
 0xaa1   :  { %v1894_v60 = vsel %vm1891_vm2, %v1893_v33, %v1889_v59 }
 0xaa2   :  { %v1896_v61 = vpack.c.bf16 %v1894_v60, %v1894_v60 }
 0xaa4   :  { %1973 = vmatmul.bf16.vlgmr.msra.gmra.mxu1 %v1896_v61 }
 0xb21   :  { %v1974_v9 = vpop.f32.mrf.mxu1 }
 0xb22   :  { %v1975_v10 = vadd.f32 %v3138_v45, %v1974_v9 }
 0xb24   :  { %3170 = vtanh.f32 %v1975_v10 }
 0xb29   :  { %v1976_v11 = vpop.f32.mrf.mxu1 }
 0xb2a   :  { %v3171_v12 = vpop.eup %3170 }
 0xb2b   :  { %v1979_v13 = vpack.c.bf16 %v3171_v12, %v3171_v12 }
 0xb2d   :  { %2133 = vmatmul.bf16.vlgmr.msra.gmra.mxu3 %v1979_v13 }
 0xbb0   :  { %v2134_v18 = vpop.f32.mrf.mxu3 }
 0xbb1   :  { %v2135_v19 = vadd.f32 %v2134_v18, %v2122_v17 }
 0xbb3   :  { %v2138_v20 = vmax.f32 %v2135_v19, 0.0 }
 0xbb5   :  { %v2139_v21 = vpack.c.bf16 %v2138_v20, %v2138_v20 }
 0xbb7   :  { %2216 = vmatmul.bf16.vlgmr.msrb.gmra.mxu0 %v2139_v21 }
 0xbb8   :  { %v2136_v22 = vpop.f32.mrf.mxu3 }
 0xc34   :  { %v2217_v24 = vpop.f32.mrf.mxu0 }
 0xc35   :  { %v2218_v25 = vadd.f32 %v3139_v23, %v2217_v24 }
 0xc37   :  { %2221 = vst [vmem:[%s3853_s25] sm:$0xff] %v2218_v25 }
 0xc3c   :  { %v2219_v1 = vpop.f32.mrf.mxu0 }
 0xc3d   :  { %2226 = vsyncpa [#allocation3], 1 }
 0xc3e   :  { %2227 = vsyncpa [#allocation5], 1 }
 0xc3f   :  { %2228 = vsyncpa [#allocation8], 1 }
 0xc40   :  { %2229 = vsyncpa [#allocation11], 1 }
 0xc41   :  { %2230 = vsyncpa [#allocation14], 1 }
 0xc42   :  { %2231 = vsyncpa [#allocation17], 1 }
 0xc43   :  { %2232 = vsyncpa [#allocation20], 1 }

</bundles_post_ra>
